<compile_context>
chip_gen: v6e
topology: v6e:2x2x1
jax: 0.10.0
libtpu: 0.0.40
codegen_flags: <defaults>
</compile_context>

<pallas_src>
import functools

import jax
import jax.numpy as jnp
from jax.experimental import pallas as pl
from jax.experimental.pallas import tpu as pltpu


# ----------------------------- fused Pallas kernel ---------------------------

def _gvcln_kernel(x_ref, adj_ref, gc1w_ref, gc1b_ref, gc2wf_ref, gc2b_ref,
                  attw_ref, attfa_ref, outwext_ref, onehot_ref, mask_ref,
                  y_ref, z_ref, l1_ref, l2_ref, cl_ref,
                  *, alpha, nheads, nclass):
    f32 = jnp.float32
    bf16 = jnp.bfloat16

    xb = x_ref[...]                    # (N, F)  bf16 — MXU operand
    adjb = adj_ref[...]                # (N, N)  bf16 — MXU operand + edge mask
    onehot = onehot_ref[...]           # (N, C)  f32
    mask = mask_ref[...]               # (N, 1)  f32
    n = xb.shape[0]
    edge = adjb > 0                    # edge mask, reused by every attention layer

    # ------------- y branch: gc1 -> relu -> folded gc2 (bf16 MXU) -----------
    h1 = jnp.dot(xb, gc1w_ref[...], preferred_element_type=f32)
    h1 = jnp.dot(adjb, h1.astype(bf16), preferred_element_type=f32) + gc1b_ref[...]
    h1 = jnp.maximum(h1, 0.0)                                    # relu
    # [y, y, y] @ W2 == y @ (W2[0:H] + W2[H:2H] + W2[2H:3H])  (folded in wrapper)
    y = jnp.dot(h1.astype(bf16), gc2wf_ref[...], preferred_element_type=f32)
    y = jnp.dot(adjb, y.astype(bf16), preferred_element_type=f32) + gc2b_ref[...]
    y_ref[...] = y

    # log_softmax(y) + masked cross-entropy (stays in VMEM)
    my = jnp.max(y, axis=1, keepdims=True)
    lse_y = jnp.log(jnp.sum(jnp.exp(y - my), axis=1, keepdims=True)) + my
    logp_y = y - lse_y
    per_y = -jnp.sum(onehot * logp_y, axis=1, keepdims=True)
    inv_msum = 1.0 / jnp.maximum(jnp.sum(mask, keepdims=True), 1e-12)
    l1_ref[...] = jnp.sum(per_y * mask, keepdims=True) * inv_msum

    # ------------- attention aggregation (exp factored out of N^2) ----------
    def att_aggregate(f1, f2, h_bf16):
        # e_ij = exp(-leakyrelu(f1_i + f2_j)) on edges; only O(N) exps.
        # (No max-subtraction stabilization — matches pyGAT reference.)
        p1 = jnp.exp(-f1)
        p2 = jnp.exp(-f2)
        q1 = jnp.exp(-alpha * f1)
        q2 = jnp.exp(-alpha * f2)
        pos = (f1 + f2.T) > 0.0                                  # branch select only
        e = jnp.where(edge, jnp.where(pos, p1 * p2.T, q1 * q2.T), 0.0)
        rowsum = jnp.maximum(jnp.sum(e, axis=1, keepdims=True), 1e-12)
        agg = jnp.dot(e.astype(bf16), h_bf16, preferred_element_type=f32)
        return agg * pl.reciprocal(rowsum, approx=True)

    def elu(v):                                                  # overflow-safe dead branch
        return jnp.where(v > 0.0, v, jnp.exp(jnp.minimum(v, 0.0)) - 1.0)

    # All heads' folded f1/f2 in one skinny matmul: (N, 2*nheads)
    fvals = jnp.dot(xb, attfa_ref[...], preferred_element_type=f32)

    hp_list = []
    for hd in range(nheads):                                     # static unroll
        h = jnp.dot(xb, attw_ref[hd], preferred_element_type=f32)  # leading-axis slab
        f1 = fvals[:, hd:hd + 1]
        f2 = fvals[:, nheads + hd:nheads + hd + 1]
        hp_list.append(elu(att_aggregate(f1, f2, h.astype(bf16))))  # concat=True -> elu
    hp_cat = hp_list[0] if nheads == 1 else jnp.concatenate(hp_list, axis=1)

    # One matmul against [outw | outw@a1 | outw@a2] gives ho and its f1/f2.
    hof = jnp.dot(hp_cat.astype(bf16), outwext_ref[...], preferred_element_type=f32)
    ho = hof[:, :nclass]
    f1o = hof[:, nclass:nclass + 1]
    f2o = hof[:, nclass + 1:nclass + 2]
    z = elu(att_aggregate(f1o, f2o, ho.astype(bf16)))            # outer F.elu
    z_ref[...] = z

    # cross-entropy for z
    mz = jnp.max(z, axis=1, keepdims=True)
    ez = jnp.exp(z - mz)
    sez = jnp.sum(ez, axis=1, keepdims=True)
    logp_z = z - (jnp.log(sez) + mz)
    per_z = -jnp.sum(onehot * logp_z, axis=1, keepdims=True)
    l2_ref[...] = jnp.sum(per_z * mask, keepdims=True) * inv_msum

    # CL loss: (-softmax(z, 1) * log_softmax(y)).mean(0).sum()
    sm_z = ez * pl.reciprocal(sez, approx=True)
    cl_ref[...] = -jnp.sum(sm_z * logp_y, keepdims=True) * (1.0 / n)


# ----------------------------- pallas_call wrapper ---------------------------

def gvcln_forward(params, x, adj, train_mask, labels_onehot, *, alpha):
    N, _ = x.shape
    nhid1 = params["gc1_w"].shape[1]
    nclass = params["gc2_w"].shape[1]
    nheads = len(params["att_heads"])
    f32, bf16 = jnp.float32, jnp.bfloat16

    # Tiny parameter-only preprocessing (exact because dropout is identity;
    # constant-folded / fused by XLA under jit).
    w2 = params["gc2_w"]
    gc2_wf = (w2[:nhid1] + w2[nhid1:2 * nhid1] + w2[2 * nhid1:]).astype(bf16)
    # Per-head weights stacked along a leading axis -> free leading-axis slices.
    att_w = jnp.stack([w for (w, _) in params["att_heads"]], axis=0).astype(bf16)
    # Folded attention vectors: f1 = x @ (W a1), f2 = x @ (W a2).
    fa1 = jnp.stack([w @ a[0] for (w, a) in params["att_heads"]], axis=1)
    fa2 = jnp.stack([w @ a[1] for (w, a) in params["att_heads"]], axis=1)
    att_fa = jnp.concatenate([fa1, fa2], axis=1).astype(bf16)      # (F, 2*nheads)
    # Out-att: append folded a1/a2 columns so one matmul yields ho, f1, f2.
    ow, oa = params["out_att_w"], params["out_att_a"]
    outw_ext = jnp.concatenate(
        [ow, (ow @ oa[0])[:, None], (ow @ oa[1])[:, None]], axis=1).astype(bf16)

    operands = (x.astype(bf16), adj.astype(bf16),
                params["gc1_w"].astype(bf16), params["gc1_b"].astype(f32),
                gc2_wf, params["gc2_b"].astype(f32),
                att_w, att_fa, outw_ext,
                labels_onehot.astype(f32), train_mask.astype(f32))
    out_shapes = (jax.ShapeDtypeStruct((N, nclass), f32),          # y
                  jax.ShapeDtypeStruct((N, nclass), f32),          # z
                  jax.ShapeDtypeStruct((1, 1), f32),               # semi_loss_1
                  jax.ShapeDtypeStruct((1, 1), f32),               # semi_loss_2
                  jax.ShapeDtypeStruct((1, 1), f32))               # CL loss

    kern = functools.partial(_gvcln_kernel, alpha=alpha, nheads=nheads,
                             nclass=nclass)
    y, z, l1, l2, cl = pl.pallas_call(
        kern,
        out_shape=out_shapes,
        # No grid: single invocation, every operand resident in VMEM exactly once
        # (no pipeline double-buffering of adj / x).
        compiler_params=pltpu.CompilerParams(
            vmem_limit_bytes=32 * 1024 * 1024),
    )(*operands)

    semi1, semi2, clv = l1[0, 0], l2[0, 0], cl[0, 0]
    loss_12 = semi1 + params["b1"] * clv
    loss_22 = semi2 + params["b2"] * clv
    return y, z, semi1, semi2, loss_12, loss_22


# ----------------------------- pure-JAX reference ----------------------------
# Full-precision (f32), unfolded reference with the original formulation.

def _ref_forward(params, x, adj, train_mask, labels_onehot, *, alpha):
    def gcn(h, w, b):
        return adj @ (h @ w) + b

    def gat(h, w, a, concat):
        hw = h @ w
        s = (hw * a[0:1]).sum(1, keepdims=True) + (hw * a[1:2]).sum(1, keepdims=True).T
        s = jnp.where(s > 0, s, alpha * s)
        e = jnp.where(adj > 0, jnp.exp(-s), 0.0)
        rowsum = jnp.maximum(e.sum(1, keepdims=True), 1e-12)
        out = (e @ hw) / rowsum
        return jax.nn.elu(out) if concat else out

    def ce(logits):
        logp = jax.nn.log_softmax(logits, axis=1)
        per = -(labels_onehot * logp).sum(1, keepdims=True)
        return (per * train_mask).sum() / train_mask.sum(), logp

    y = jax.nn.relu(gcn(x, params["gc1_w"], params["gc1_b"]))
    y = jnp.concatenate([y, y, y], axis=1)
    y = gcn(y, params["gc2_w"], params["gc2_b"])
    l1, logp = ce(y)
    z = jnp.concatenate([gat(x, w, a, True) for (w, a) in params["att_heads"]], axis=1)
    z = jax.nn.elu(gat(z, params["out_att_w"], params["out_att_a"], False))
    l2, _ = ce(z)
    cl = (-jax.nn.softmax(z, axis=1) * logp).mean(0).sum()
    return y, z, l1, l2, l1 + params["b1"] * cl, l2 + params["b2"] * cl


# ----------------------------- main -----------------------------------------

if __name__ == "__main__":
    N, nfeat, nclass = 16, 32, 8
    nhid_1, nhid_2, nheads_2 = 16, 16, 2
    alpha_2 = 0.2

    key = jax.random.PRNGKey(0)
    keys = jax.random.split(key, 12)

    def glorot(k, shape):
        lim = jnp.sqrt(6.0 / (shape[0] + shape[1]))
        return jax.random.uniform(k, shape, jnp.float32, -lim, lim)

    params = {
        "gc1_w": glorot(keys[0], (nfeat, nhid_1)),
        "gc1_b": glorot(keys[1], (1, nhid_1)),
        "gc2_w": glorot(keys[2], (nhid_1 * 3, nclass)),
        "gc2_b": glorot(keys[3], (1, nclass)),
        "att_heads": [
            (glorot(keys[4 + 2 * h], (nfeat, nhid_2)),
             glorot(keys[5 + 2 * h], (2, nhid_2)))     # (a1; a2) split of (1, 2*nhid_2)
            for h in range(nheads_2)
        ],
        "out_att_w": glorot(keys[8], (nhid_2 * nheads_2, nclass)),
        "out_att_a": glorot(keys[9], (2, nclass)),
        "b1": jnp.float32(0.05),
        "b2": jnp.float32(0.05),
    }

    # Inputs
    x = jax.random.normal(keys[10], (N, nfeat), jnp.float32)
    a_rand = (jax.random.uniform(keys[11], (N, N)) < 0.3).astype(jnp.float32)
    adj_bin = jnp.clip(a_rand + a_rand.T + jnp.eye(N, dtype=jnp.float32), 0.0, 1.0)
    adj = adj_bin / jnp.sum(adj_bin, axis=1, keepdims=True)      # row-normalized, self-loops

    labels = jax.random.randint(jax.random.PRNGKey(1), (N,), 0, nclass)
    labels_onehot = jax.nn.one_hot(labels, nclass, dtype=jnp.float32)
    idx_train = jnp.arange(N // 2)                               # first 8 nodes
    train_mask = jnp.zeros((N, 1), jnp.float32).at[idx_train, 0].set(1.0)

    fwd = jax.jit(functools.partial(gvcln_forward, alpha=alpha_2))
    outs = fwd(params, x, adj, train_mask, labels_onehot)
    outs = jax.block_until_ready(outs)

    # Sanity check against the pure-f32 reference. The kernel uses bf16 MXU
    # operands (+ approx reciprocals), so tolerance accounts for bf16 precision.
    refs = _ref_forward(params, x, adj, train_mask, labels_onehot, alpha=alpha_2)
    for o, r in zip(outs, refs):
        assert jnp.allclose(o, r, rtol=5e-2, atol=5e-2), (o, r)

    print("KERNEL_OK")
</pallas_src>

<mosaic_0001>
module attributes {stable_mosaic.version = 11 : i64} {
  func.func @_gvcln_kernel(%arg0: memref<16x32xbf16, #tpu.memory_space<vmem>>, %arg1: memref<16x16xbf16, #tpu.memory_space<vmem>>, %arg2: memref<32x16xbf16, #tpu.memory_space<vmem>>, %arg3: memref<1x16xf32, #tpu.memory_space<vmem>>, %arg4: memref<16x8xbf16, #tpu.memory_space<vmem>>, %arg5: memref<1x8xf32, #tpu.memory_space<vmem>>, %arg6: memref<2x32x16xbf16, #tpu.memory_space<vmem>>, %arg7: memref<32x4xbf16, #tpu.memory_space<vmem>>, %arg8: memref<32x10xbf16, #tpu.memory_space<vmem>>, %arg9: memref<16x8xf32, #tpu.memory_space<vmem>>, %arg10: memref<16x1xf32, #tpu.memory_space<vmem>>, %arg11: memref<16x8xf32, #tpu.memory_space<vmem>>, %arg12: memref<16x8xf32, #tpu.memory_space<vmem>>, %arg13: memref<1x1xf32, #tpu.memory_space<vmem>>, %arg14: memref<1x1xf32, #tpu.memory_space<vmem>>, %arg15: memref<1x1xf32, #tpu.memory_space<vmem>>) attributes {dimension_semantics = [], scalar_prefetch = 0 : i64, scratch_operands = 0 : i64, tpu.core_type = #tpu.core_type<tc>} {
    %c0 = arith.constant 0 : index
    %c0_0 = arith.constant 0 : index
    %0 = vector.load %arg0[%c0, %c0_0] : memref<16x32xbf16, #tpu.memory_space<vmem>>, vector<16x32xbf16>
    %c0_1 = arith.constant 0 : index
    %c0_2 = arith.constant 0 : index
    %1 = vector.load %arg1[%c0_1, %c0_2] : memref<16x16xbf16, #tpu.memory_space<vmem>>, vector<16x16xbf16>
    %c0_3 = arith.constant 0 : index
    %c0_4 = arith.constant 0 : index
    %2 = vector.load %arg9[%c0_3, %c0_4] : memref<16x8xf32, #tpu.memory_space<vmem>>, vector<16x8xf32>
    %c0_5 = arith.constant 0 : index
    %c0_6 = arith.constant 0 : index
    %3 = vector.load %arg10[%c0_5, %c0_6] : memref<16x1xf32, #tpu.memory_space<vmem>>, vector<16x1xf32>
    %cst = arith.constant 0.000000e+00 : bf16
    %4 = vector.broadcast %cst : bf16 to vector<16x16xbf16>
    %5 = arith.cmpf ogt, %1, %4 : vector<16x16xbf16>
    %c0_7 = arith.constant 0 : index
    %c0_8 = arith.constant 0 : index
    %6 = vector.load %arg2[%c0_7, %c0_8] : memref<32x16xbf16, #tpu.memory_space<vmem>>, vector<32x16xbf16>
    %cst_9 = arith.constant dense<0.000000e+00> : vector<16x16xf32>
    %7 = tpu.matmul %0, %6, %cst_9 {dimension_numbers = #tpu.dot_dimension_numbers<[1], [0], [0], [1], [0, 0, 1, 1], [], []>} : vector<16x32xbf16>, vector<32x16xbf16>, vector<16x16xf32> -> vector<16x16xf32>
    %8 = arith.truncf %7 : vector<16x16xf32> to vector<16x16xbf16>
    %cst_10 = arith.constant dense<0.000000e+00> : vector<16x16xf32>
    %9 = tpu.matmul %1, %8, %cst_10 {dimension_numbers = #tpu.dot_dimension_numbers<[1], [0], [0], [1], [0, 0, 1, 1], [], []>} : vector<16x16xbf16>, vector<16x16xbf16>, vector<16x16xf32> -> vector<16x16xf32>
    %c0_11 = arith.constant 0 : index
    %c0_12 = arith.constant 0 : index
    %10 = vector.load %arg3[%c0_11, %c0_12] : memref<1x16xf32, #tpu.memory_space<vmem>>, vector<1x16xf32>
    %11 = vector.broadcast %10 : vector<1x16xf32> to vector<16x16xf32>
    %12 = arith.addf %9, %11 : vector<16x16xf32>
    %cst_13 = arith.constant 0.000000e+00 : f32
    %13 = vector.broadcast %cst_13 : f32 to vector<16x16xf32>
    %14 = arith.maximumf %12, %13 : vector<16x16xf32>
    %15 = arith.truncf %14 : vector<16x16xf32> to vector<16x16xbf16>
    %c0_14 = arith.constant 0 : index
    %c0_15 = arith.constant 0 : index
    %16 = vector.load %arg4[%c0_14, %c0_15] : memref<16x8xbf16, #tpu.memory_space<vmem>>, vector<16x8xbf16>
    %cst_16 = arith.constant dense<0.000000e+00> : vector<16x8xf32>
    %17 = tpu.matmul %15, %16, %cst_16 {dimension_numbers = #tpu.dot_dimension_numbers<[1], [0], [0], [1], [0, 0, 1, 1], [], []>} : vector<16x16xbf16>, vector<16x8xbf16>, vector<16x8xf32> -> vector<16x8xf32>
    %18 = arith.truncf %17 : vector<16x8xf32> to vector<16x8xbf16>
    %cst_17 = arith.constant dense<0.000000e+00> : vector<16x8xf32>
    %19 = tpu.matmul %1, %18, %cst_17 {dimension_numbers = #tpu.dot_dimension_numbers<[1], [0], [0], [1], [0, 0, 1, 1], [], []>} : vector<16x16xbf16>, vector<16x8xbf16>, vector<16x8xf32> -> vector<16x8xf32>
    %c0_18 = arith.constant 0 : index
    %c0_19 = arith.constant 0 : index
    %20 = vector.load %arg5[%c0_18, %c0_19] : memref<1x8xf32, #tpu.memory_space<vmem>>, vector<1x8xf32>
    %21 = vector.broadcast %20 : vector<1x8xf32> to vector<16x8xf32>
    %22 = arith.addf %19, %21 : vector<16x8xf32>
    %c0_20 = arith.constant 0 : index
    %c0_21 = arith.constant 0 : index
    %23 = vector.load %arg11[%c0_20, %c0_21] : memref<16x8xf32, #tpu.memory_space<vmem>>, vector<16x8xf32>
    tpu.vector_store %arg11[%c0_20, %c0_21], %22 {strides = array<i32>} : memref<16x8xf32, #tpu.memory_space<vmem>>, vector<16x8xf32>,
    %cst_22 = arith.constant dense<0xFF800000> : vector<16xf32>
    %24 = vector.multi_reduction <maximumf>, %22, %cst_22 [1] : vector<16x8xf32> to vector<16xf32>
    %25 = vector.shape_cast %24 : vector<16xf32> to vector<16x1xf32>
    %26 = vector.broadcast %25 : vector<16x1xf32> to vector<16x8xf32>
    %27 = arith.subf %22, %26 : vector<16x8xf32>
    %28 = math.exp %27 : vector<16x8xf32>
    %cst_23 = arith.constant dense<0.000000e+00> : vector<16xf32>
    %29 = vector.multi_reduction <add>, %28, %cst_23 [1] : vector<16x8xf32> to vector<16xf32>
    %30 = vector.shape_cast %29 : vector<16xf32> to vector<16x1xf32>
    %31 = math.log %30 : vector<16x1xf32>
    %32 = arith.addf %31, %25 : vector<16x1xf32>
    %33 = vector.broadcast %32 : vector<16x1xf32> to vector<16x8xf32>
    %34 = arith.subf %22, %33 : vector<16x8xf32>
    %35 = arith.mulf %2, %34 : vector<16x8xf32>
    %cst_24 = arith.constant dense<0.000000e+00> : vector<16xf32>
    %36 = vector.multi_reduction <add>, %35, %cst_24 [1] : vector<16x8xf32> to vector<16xf32>
    %37 = vector.shape_cast %36 : vector<16xf32> to vector<16x1xf32>
    %cst_25 = arith.constant 0.000000e+00 : f32
    %38 = vector.broadcast %cst_25 : f32 to vector<16x1xf32>
    %39 = arith.subf %38, %37 : vector<16x1xf32>
    %40 = vector.shape_cast %3 : vector<16x1xf32> to vector<1x16x1xf32>
    %cst_26 = arith.constant dense<0.000000e+00> : vector<1xf32>
    %41 = vector.multi_reduction <add>, %40, %cst_26 [1, 2] : vector<1x16x1xf32> to vector<1xf32>
    %42 = vector.shape_cast %41 : vector<1xf32> to vector<1x1x1xf32>
    %43 = vector.extract %42[0, 0, 0] : f32 from vector<1x1x1xf32>
    %44 = vector.broadcast %43 : f32 to vector<1x1xf32>
    %cst_27 = arith.constant 9.99999996E-13 : f32
    %45 = vector.broadcast %cst_27 : f32 to vector<1x1xf32>
    %46 = arith.maximumf %44, %45 : vector<1x1xf32>
    %cst_28 = arith.constant 1.000000e+00 : f32
    %47 = vector.broadcast %cst_28 : f32 to vector<1x1xf32>
    %48 = arith.divf %47, %46 : vector<1x1xf32>
    %49 = arith.mulf %39, %3 : vector<16x1xf32>
    %50 = vector.shape_cast %49 : vector<16x1xf32> to vector<1x16x1xf32>
    %cst_29 = arith.constant dense<0.000000e+00> : vector<1xf32>
    %51 = vector.multi_reduction <add>, %50, %cst_29 [1, 2] : vector<1x16x1xf32> to vector<1xf32>
    %52 = vector.shape_cast %51 : vector<1xf32> to vector<1x1x1xf32>
    %53 = vector.extract %52[0, 0, 0] : f32 from vector<1x1x1xf32>
    %54 = vector.broadcast %53 : f32 to vector<1x1xf32>
    %55 = arith.mulf %54, %48 : vector<1x1xf32>
    %c0_30 = arith.constant 0 : index
    %c0_31 = arith.constant 0 : index
    %56 = vector.load %arg13[%c0_30, %c0_31] : memref<1x1xf32, #tpu.memory_space<vmem>>, vector<1x1xf32>
    tpu.vector_store %arg13[%c0_30, %c0_31], %55 {strides = array<i32>} : memref<1x1xf32, #tpu.memory_space<vmem>>, vector<1x1xf32>,
    %c0_32 = arith.constant 0 : index
    %c0_33 = arith.constant 0 : index
    %57 = vector.load %arg7[%c0_32, %c0_33] : memref<32x4xbf16, #tpu.memory_space<vmem>>, vector<32x4xbf16>
    %cst_34 = arith.constant dense<0.000000e+00> : vector<16x4xf32>
    %58 = tpu.matmul %0, %57, %cst_34 {dimension_numbers = #tpu.dot_dimension_numbers<[1], [0], [0], [1], [0, 0, 1, 1], [], []>} : vector<16x32xbf16>, vector<32x4xbf16>, vector<16x4xf32> -> vector<16x4xf32>
    %c0_35 = arith.constant 0 : index
    %c0_36 = arith.constant 0 : index
    %c0_37 = arith.constant 0 : index
    %59 = vector.load %arg6[%c0_35, %c0_36, %c0_37] : memref<2x32x16xbf16, #tpu.memory_space<vmem>>, vector<1x32x16xbf16>
    %60 = vector.shape_cast %59 : vector<1x32x16xbf16> to vector<32x16xbf16>
    %cst_38 = arith.constant dense<0.000000e+00> : vector<16x16xf32>
    %61 = tpu.matmul %0, %60, %cst_38 {dimension_numbers = #tpu.dot_dimension_numbers<[1], [0], [0], [1], [0, 0, 1, 1], [], []>} : vector<16x32xbf16>, vector<32x16xbf16>, vector<16x16xf32> -> vector<16x16xf32>
    %62 = vector.extract_strided_slice %58 {offsets = [0, 0], sizes = [16, 1], strides = [1, 1]} : vector<16x4xf32> to vector<16x1xf32>
    %63 = vector.extract_strided_slice %58 {offsets = [0, 2], sizes = [16, 1], strides = [1, 1]} : vector<16x4xf32> to vector<16x1xf32>
    %64 = arith.truncf %61 : vector<16x16xf32> to vector<16x16xbf16>
    %cst_39 = arith.constant 0.000000e+00 : f32
    %65 = vector.broadcast %cst_39 : f32 to vector<16x1xf32>
    %66 = arith.subf %65, %62 : vector<16x1xf32>
    %67 = math.exp %66 : vector<16x1xf32>
    %cst_40 = arith.constant 0.000000e+00 : f32
    %68 = vector.broadcast %cst_40 : f32 to vector<16x1xf32>
    %69 = arith.subf %68, %63 : vector<16x1xf32>
    %70 = math.exp %69 : vector<16x1xf32>
    %cst_41 = arith.constant -2.000000e-01 : f32
    %71 = vector.broadcast %cst_41 : f32 to vector<16x1xf32>
    %72 = arith.mulf %71, %62 : vector<16x1xf32>
    %73 = math.exp %72 : vector<16x1xf32>
    %cst_42 = arith.constant -2.000000e-01 : f32
    %74 = vector.broadcast %cst_42 : f32 to vector<16x1xf32>
    %75 = arith.mulf %74, %63 : vector<16x1xf32>
    %76 = math.exp %75 : vector<16x1xf32>
    %77 = tpu.transpose %63, [1, 0] : vector<16x1xf32> -> vector<1x16xf32>
    %78 = vector.broadcast %62 : vector<16x1xf32> to vector<16x16xf32>
    %79 = vector.broadcast %77 : vector<1x16xf32> to vector<16x16xf32>
    %80 = arith.addf %78, %79 : vector<16x16xf32>
    %cst_43 = arith.constant 0.000000e+00 : f32
    %81 = vector.broadcast %cst_43 : f32 to vector<16x16xf32>
    %82 = arith.cmpf ogt, %80, %81 : vector<16x16xf32>
    %83 = tpu.transpose %70, [1, 0] : vector<16x1xf32> -> vector<1x16xf32>
    %84 = vector.broadcast %67 : vector<16x1xf32> to vector<16x16xf32>
    %85 = vector.broadcast %83 : vector<1x16xf32> to vector<16x16xf32>
    %86 = arith.mulf %84, %85 : vector<16x16xf32>
    %87 = tpu.transpose %76, [1, 0] : vector<16x1xf32> -> vector<1x16xf32>
    %88 = vector.broadcast %73 : vector<16x1xf32> to vector<16x16xf32>
    %89 = vector.broadcast %87 : vector<1x16xf32> to vector<16x16xf32>
    %90 = arith.mulf %88, %89 : vector<16x16xf32>
    %91 = arith.select %82, %86, %90 : vector<16x16xi1>, vector<16x16xf32>
    %cst_44 = arith.constant 0.000000e+00 : f32
    %92 = vector.broadcast %cst_44 : f32 to vector<16x16xf32>
    %93 = arith.select %5, %91, %92 : vector<16x16xi1>, vector<16x16xf32>
    %cst_45 = arith.constant dense<0.000000e+00> : vector<16xf32>
    %94 = vector.multi_reduction <add>, %93, %cst_45 [1] : vector<16x16xf32> to vector<16xf32>
    %95 = vector.shape_cast %94 : vector<16xf32> to vector<16x1xf32>
    %cst_46 = arith.constant 9.99999996E-13 : f32
    %96 = vector.broadcast %cst_46 : f32 to vector<16x1xf32>
    %97 = arith.maximumf %95, %96 : vector<16x1xf32>
    %98 = arith.truncf %93 : vector<16x16xf32> to vector<16x16xbf16>
    %cst_47 = arith.constant dense<0.000000e+00> : vector<16x16xf32>
    %99 = tpu.matmul %98, %64, %cst_47 {dimension_numbers = #tpu.dot_dimension_numbers<[1], [0], [0], [1], [0, 0, 1, 1], [], []>} : vector<16x16xbf16>, vector<16x16xbf16>, vector<16x16xf32> -> vector<16x16xf32>
    %100 = tpu.reciprocal %97 {approx = true} : vector<16x1xf32> -> vector<16x1xf32>
    %101 = vector.broadcast %100 : vector<16x1xf32> to vector<16x16xf32>
    %102 = arith.mulf %99, %101 : vector<16x16xf32>
    %cst_48 = arith.constant 0.000000e+00 : f32
    %103 = vector.broadcast %cst_48 : f32 to vector<16x16xf32>
    %104 = arith.cmpf ogt, %102, %103 : vector<16x16xf32>
    %cst_49 = arith.constant 0.000000e+00 : f32
    %105 = vector.broadcast %cst_49 : f32 to vector<16x16xf32>
    %106 = arith.minimumf %102, %105 : vector<16x16xf32>
    %107 = math.exp %106 : vector<16x16xf32>
    %cst_50 = arith.constant 1.000000e+00 : f32
    %108 = vector.broadcast %cst_50 : f32 to vector<16x16xf32>
    %109 = arith.subf %107, %108 : vector<16x16xf32>
    %110 = arith.select %104, %102, %109 : vector<16x16xi1>, vector<16x16xf32>
    %c1 = arith.constant 1 : index
    %c0_51 = arith.constant 0 : index
    %c0_52 = arith.constant 0 : index
    %111 = vector.load %arg6[%c1, %c0_51, %c0_52] : memref<2x32x16xbf16, #tpu.memory_space<vmem>>, vector<1x32x16xbf16>
    %112 = vector.shape_cast %111 : vector<1x32x16xbf16> to vector<32x16xbf16>
    %cst_53 = arith.constant dense<0.000000e+00> : vector<16x16xf32>
    %113 = tpu.matmul %0, %112, %cst_53 {dimension_numbers = #tpu.dot_dimension_numbers<[1], [0], [0], [1], [0, 0, 1, 1], [], []>} : vector<16x32xbf16>, vector<32x16xbf16>, vector<16x16xf32> -> vector<16x16xf32>
    %114 = vector.extract_strided_slice %58 {offsets = [0, 1], sizes = [16, 1], strides = [1, 1]} : vector<16x4xf32> to vector<16x1xf32>
    %115 = vector.extract_strided_slice %58 {offsets = [0, 3], sizes = [16, 1], strides = [1, 1]} : vector<16x4xf32> to vector<16x1xf32>
    %116 = arith.truncf %113 : vector<16x16xf32> to vector<16x16xbf16>
    %cst_54 = arith.constant 0.000000e+00 : f32
    %117 = vector.broadcast %cst_54 : f32 to vector<16x1xf32>
    %118 = arith.subf %117, %114 : vector<16x1xf32>
    %119 = math.exp %118 : vector<16x1xf32>
    %cst_55 = arith.constant 0.000000e+00 : f32
    %120 = vector.broadcast %cst_55 : f32 to vector<16x1xf32>
    %121 = arith.subf %120, %115 : vector<16x1xf32>
    %122 = math.exp %121 : vector<16x1xf32>
    %cst_56 = arith.constant -2.000000e-01 : f32
    %123 = vector.broadcast %cst_56 : f32 to vector<16x1xf32>
    %124 = arith.mulf %123, %114 : vector<16x1xf32>
    %125 = math.exp %124 : vector<16x1xf32>
    %cst_57 = arith.constant -2.000000e-01 : f32
    %126 = vector.broadcast %cst_57 : f32 to vector<16x1xf32>
    %127 = arith.mulf %126, %115 : vector<16x1xf32>
    %128 = math.exp %127 : vector<16x1xf32>
    %129 = tpu.transpose %115, [1, 0] : vector<16x1xf32> -> vector<1x16xf32>
    %130 = vector.broadcast %114 : vector<16x1xf32> to vector<16x16xf32>
    %131 = vector.broadcast %129 : vector<1x16xf32> to vector<16x16xf32>
    %132 = arith.addf %130, %131 : vector<16x16xf32>
    %cst_58 = arith.constant 0.000000e+00 : f32
    %133 = vector.broadcast %cst_58 : f32 to vector<16x16xf32>
    %134 = arith.cmpf ogt, %132, %133 : vector<16x16xf32>
    %135 = tpu.transpose %122, [1, 0] : vector<16x1xf32> -> vector<1x16xf32>
    %136 = vector.broadcast %119 : vector<16x1xf32> to vector<16x16xf32>
    %137 = vector.broadcast %135 : vector<1x16xf32> to vector<16x16xf32>
    %138 = arith.mulf %136, %137 : vector<16x16xf32>
    %139 = tpu.transpose %128, [1, 0] : vector<16x1xf32> -> vector<1x16xf32>
    %140 = vector.broadcast %125 : vector<16x1xf32> to vector<16x16xf32>
    %141 = vector.broadcast %139 : vector<1x16xf32> to vector<16x16xf32>
    %142 = arith.mulf %140, %141 : vector<16x16xf32>
    %143 = arith.select %134, %138, %142 : vector<16x16xi1>, vector<16x16xf32>
    %cst_59 = arith.constant 0.000000e+00 : f32
    %144 = vector.broadcast %cst_59 : f32 to vector<16x16xf32>
    %145 = arith.select %5, %143, %144 : vector<16x16xi1>, vector<16x16xf32>
    %cst_60 = arith.constant dense<0.000000e+00> : vector<16xf32>
    %146 = vector.multi_reduction <add>, %145, %cst_60 [1] : vector<16x16xf32> to vector<16xf32>
    %147 = vector.shape_cast %146 : vector<16xf32> to vector<16x1xf32>
    %cst_61 = arith.constant 9.99999996E-13 : f32
    %148 = vector.broadcast %cst_61 : f32 to vector<16x1xf32>
    %149 = arith.maximumf %147, %148 : vector<16x1xf32>
    %150 = arith.truncf %145 : vector<16x16xf32> to vector<16x16xbf16>
    %cst_62 = arith.constant dense<0.000000e+00> : vector<16x16xf32>
    %151 = tpu.matmul %150, %116, %cst_62 {dimension_numbers = #tpu.dot_dimension_numbers<[1], [0], [0], [1], [0, 0, 1, 1], [], []>} : vector<16x16xbf16>, vector<16x16xbf16>, vector<16x16xf32> -> vector<16x16xf32>
    %152 = tpu.reciprocal %149 {approx = true} : vector<16x1xf32> -> vector<16x1xf32>
    %153 = vector.broadcast %152 : vector<16x1xf32> to vector<16x16xf32>
    %154 = arith.mulf %151, %153 : vector<16x16xf32>
    %cst_63 = arith.constant 0.000000e+00 : f32
    %155 = vector.broadcast %cst_63 : f32 to vector<16x16xf32>
    %156 = arith.cmpf ogt, %154, %155 : vector<16x16xf32>
    %cst_64 = arith.constant 0.000000e+00 : f32
    %157 = vector.broadcast %cst_64 : f32 to vector<16x16xf32>
    %158 = arith.minimumf %154, %157 : vector<16x16xf32>
    %159 = math.exp %158 : vector<16x16xf32>
    %cst_65 = arith.constant 1.000000e+00 : f32
    %160 = vector.broadcast %cst_65 : f32 to vector<16x16xf32>
    %161 = arith.subf %159, %160 : vector<16x16xf32>
    %162 = arith.select %156, %154, %161 : vector<16x16xi1>, vector<16x16xf32>
    %163 = tpu.concatenate %110, %162 in 1 : vector<16x16xf32>, vector<16x16xf32> -> vector<16x32xf32>
    %164 = arith.truncf %163 : vector<16x32xf32> to vector<16x32xbf16>
    %c0_66 = arith.constant 0 : index
    %c0_67 = arith.constant 0 : index
    %165 = vector.load %arg8[%c0_66, %c0_67] : memref<32x10xbf16, #tpu.memory_space<vmem>>, vector<32x10xbf16>
    %cst_68 = arith.constant dense<0.000000e+00> : vector<16x10xf32>
    %166 = tpu.matmul %164, %165, %cst_68 {dimension_numbers = #tpu.dot_dimension_numbers<[1], [0], [0], [1], [0, 0, 1, 1], [], []>} : vector<16x32xbf16>, vector<32x10xbf16>, vector<16x10xf32> -> vector<16x10xf32>
    %167 = vector.extract_strided_slice %166 {offsets = [0, 0], sizes = [16, 8], strides = [1, 1]} : vector<16x10xf32> to vector<16x8xf32>
    %168 = vector.extract_strided_slice %166 {offsets = [0, 8], sizes = [16, 1], strides = [1, 1]} : vector<16x10xf32> to vector<16x1xf32>
    %169 = vector.extract_strided_slice %166 {offsets = [0, 9], sizes = [16, 1], strides = [1, 1]} : vector<16x10xf32> to vector<16x1xf32>
    %170 = arith.truncf %167 : vector<16x8xf32> to vector<16x8xbf16>
    %cst_69 = arith.constant 0.000000e+00 : f32
    %171 = vector.broadcast %cst_69 : f32 to vector<16x1xf32>
    %172 = arith.subf %171, %168 : vector<16x1xf32>
    %173 = math.exp %172 : vector<16x1xf32>
    %cst_70 = arith.constant 0.000000e+00 : f32
    %174 = vector.broadcast %cst_70 : f32 to vector<16x1xf32>
    %175 = arith.subf %174, %169 : vector<16x1xf32>
    %176 = math.exp %175 : vector<16x1xf32>
    %cst_71 = arith.constant -2.000000e-01 : f32
    %177 = vector.broadcast %cst_71 : f32 to vector<16x1xf32>
    %178 = arith.mulf %177, %168 : vector<16x1xf32>
    %179 = math.exp %178 : vector<16x1xf32>
    %cst_72 = arith.constant -2.000000e-01 : f32
    %180 = vector.broadcast %cst_72 : f32 to vector<16x1xf32>
    %181 = arith.mulf %180, %169 : vector<16x1xf32>
    %182 = math.exp %181 : vector<16x1xf32>
    %183 = tpu.transpose %169, [1, 0] : vector<16x1xf32> -> vector<1x16xf32>
    %184 = vector.broadcast %168 : vector<16x1xf32> to vector<16x16xf32>
    %185 = vector.broadcast %183 : vector<1x16xf32> to vector<16x16xf32>
    %186 = arith.addf %184, %185 : vector<16x16xf32>
    %cst_73 = arith.constant 0.000000e+00 : f32
    %187 = vector.broadcast %cst_73 : f32 to vector<16x16xf32>
    %188 = arith.cmpf ogt, %186, %187 : vector<16x16xf32>
    %189 = tpu.transpose %176, [1, 0] : vector<16x1xf32> -> vector<1x16xf32>
    %190 = vector.broadcast %173 : vector<16x1xf32> to vector<16x16xf32>
    %191 = vector.broadcast %189 : vector<1x16xf32> to vector<16x16xf32>
    %192 = arith.mulf %190, %191 : vector<16x16xf32>
    %193 = tpu.transpose %182, [1, 0] : vector<16x1xf32> -> vector<1x16xf32>
    %194 = vector.broadcast %179 : vector<16x1xf32> to vector<16x16xf32>
    %195 = vector.broadcast %193 : vector<1x16xf32> to vector<16x16xf32>
    %196 = arith.mulf %194, %195 : vector<16x16xf32>
    %197 = arith.select %188, %192, %196 : vector<16x16xi1>, vector<16x16xf32>
    %cst_74 = arith.constant 0.000000e+00 : f32
    %198 = vector.broadcast %cst_74 : f32 to vector<16x16xf32>
    %199 = arith.select %5, %197, %198 : vector<16x16xi1>, vector<16x16xf32>
    %cst_75 = arith.constant dense<0.000000e+00> : vector<16xf32>
    %200 = vector.multi_reduction <add>, %199, %cst_75 [1] : vector<16x16xf32> to vector<16xf32>
    %201 = vector.shape_cast %200 : vector<16xf32> to vector<16x1xf32>
    %cst_76 = arith.constant 9.99999996E-13 : f32
    %202 = vector.broadcast %cst_76 : f32 to vector<16x1xf32>
    %203 = arith.maximumf %201, %202 : vector<16x1xf32>
    %204 = arith.truncf %199 : vector<16x16xf32> to vector<16x16xbf16>
    %cst_77 = arith.constant dense<0.000000e+00> : vector<16x8xf32>
    %205 = tpu.matmul %204, %170, %cst_77 {dimension_numbers = #tpu.dot_dimension_numbers<[1], [0], [0], [1], [0, 0, 1, 1], [], []>} : vector<16x16xbf16>, vector<16x8xbf16>, vector<16x8xf32> -> vector<16x8xf32>
    %206 = tpu.reciprocal %203 {approx = true} : vector<16x1xf32> -> vector<16x1xf32>
    %207 = vector.broadcast %206 : vector<16x1xf32> to vector<16x8xf32>
    %208 = arith.mulf %205, %207 : vector<16x8xf32>
    %cst_78 = arith.constant 0.000000e+00 : f32
    %209 = vector.broadcast %cst_78 : f32 to vector<16x8xf32>
    %210 = arith.cmpf ogt, %208, %209 : vector<16x8xf32>
    %cst_79 = arith.constant 0.000000e+00 : f32
    %211 = vector.broadcast %cst_79 : f32 to vector<16x8xf32>
    %212 = arith.minimumf %208, %211 : vector<16x8xf32>
    %213 = math.exp %212 : vector<16x8xf32>
    %cst_80 = arith.constant 1.000000e+00 : f32
    %214 = vector.broadcast %cst_80 : f32 to vector<16x8xf32>
    %215 = arith.subf %213, %214 : vector<16x8xf32>
    %216 = arith.select %210, %208, %215 : vector<16x8xi1>, vector<16x8xf32>
    %c0_81 = arith.constant 0 : index
    %c0_82 = arith.constant 0 : index
    %217 = vector.load %arg12[%c0_81, %c0_82] : memref<16x8xf32, #tpu.memory_space<vmem>>, vector<16x8xf32>
    tpu.vector_store %arg12[%c0_81, %c0_82], %216 {strides = array<i32>} : memref<16x8xf32, #tpu.memory_space<vmem>>, vector<16x8xf32>,
    %cst_83 = arith.constant dense<0xFF800000> : vector<16xf32>
    %218 = vector.multi_reduction <maximumf>, %216, %cst_83 [1] : vector<16x8xf32> to vector<16xf32>
    %219 = vector.shape_cast %218 : vector<16xf32> to vector<16x1xf32>
    %220 = vector.broadcast %219 : vector<16x1xf32> to vector<16x8xf32>
    %221 = arith.subf %216, %220 : vector<16x8xf32>
    %222 = math.exp %221 : vector<16x8xf32>
    %cst_84 = arith.constant dense<0.000000e+00> : vector<16xf32>
    %223 = vector.multi_reduction <add>, %222, %cst_84 [1] : vector<16x8xf32> to vector<16xf32>
    %224 = vector.shape_cast %223 : vector<16xf32> to vector<16x1xf32>
    %225 = math.log %224 : vector<16x1xf32>
    %226 = arith.addf %225, %219 : vector<16x1xf32>
    %227 = vector.broadcast %226 : vector<16x1xf32> to vector<16x8xf32>
    %228 = arith.subf %216, %227 : vector<16x8xf32>
    %229 = arith.mulf %2, %228 : vector<16x8xf32>
    %cst_85 = arith.constant dense<0.000000e+00> : vector<16xf32>
    %230 = vector.multi_reduction <add>, %229, %cst_85 [1] : vector<16x8xf32> to vector<16xf32>
    %231 = vector.shape_cast %230 : vector<16xf32> to vector<16x1xf32>
    %cst_86 = arith.constant 0.000000e+00 : f32
    %232 = vector.broadcast %cst_86 : f32 to vector<16x1xf32>
    %233 = arith.subf %232, %231 : vector<16x1xf32>
    %234 = arith.mulf %233, %3 : vector<16x1xf32>
    %235 = vector.shape_cast %234 : vector<16x1xf32> to vector<1x16x1xf32>
    %cst_87 = arith.constant dense<0.000000e+00> : vector<1xf32>
    %236 = vector.multi_reduction <add>, %235, %cst_87 [1, 2] : vector<1x16x1xf32> to vector<1xf32>
    %237 = vector.shape_cast %236 : vector<1xf32> to vector<1x1x1xf32>
    %238 = vector.extract %237[0, 0, 0] : f32 from vector<1x1x1xf32>
    %239 = vector.broadcast %238 : f32 to vector<1x1xf32>
    %240 = arith.mulf %239, %48 : vector<1x1xf32>
    %c0_88 = arith.constant 0 : index
    %c0_89 = arith.constant 0 : index
    %241 = vector.load %arg14[%c0_88, %c0_89] : memref<1x1xf32, #tpu.memory_space<vmem>>, vector<1x1xf32>
    tpu.vector_store %arg14[%c0_88, %c0_89], %240 {strides = array<i32>} : memref<1x1xf32, #tpu.memory_space<vmem>>, vector<1x1xf32>,
    %242 = tpu.reciprocal %224 {approx = true} : vector<16x1xf32> -> vector<16x1xf32>
    %243 = vector.broadcast %242 : vector<16x1xf32> to vector<16x8xf32>
    %244 = arith.mulf %222, %243 : vector<16x8xf32>
    %245 = arith.mulf %244, %34 : vector<16x8xf32>
    %246 = vector.shape_cast %245 : vector<16x8xf32> to vector<1x16x8xf32>
    %cst_90 = arith.constant dense<0.000000e+00> : vector<1xf32>
    %247 = vector.multi_reduction <add>, %246, %cst_90 [1, 2] : vector<1x16x8xf32> to vector<1xf32>
    %248 = vector.shape_cast %247 : vector<1xf32> to vector<1x1x1xf32>
    %249 = vector.extract %248[0, 0, 0] : f32 from vector<1x1x1xf32>
    %250 = vector.broadcast %249 : f32 to vector<1x1xf32>
    %cst_91 = arith.constant 0.000000e+00 : f32
    %251 = vector.broadcast %cst_91 : f32 to vector<1x1xf32>
    %252 = arith.subf %251, %250 : vector<1x1xf32>
    %cst_92 = arith.constant 6.250000e-02 : f32
    %253 = vector.broadcast %cst_92 : f32 to vector<1x1xf32>
    %254 = arith.mulf %252, %253 : vector<1x1xf32>
    %c0_93 = arith.constant 0 : index
    %c0_94 = arith.constant 0 : index
    %255 = vector.load %arg15[%c0_93, %c0_94] : memref<1x1xf32, #tpu.memory_space<vmem>>, vector<1x1xf32>
    tpu.vector_store %arg15[%c0_93, %c0_94], %254 {strides = array<i32>} : memref<1x1xf32, #tpu.memory_space<vmem>>, vector<1x1xf32>,
    return
  }
}

</mosaic_0001>

<bundles_post_ra>
// kernel: gvcln_forward.1
= control target key start
LH: loop header
LB: loop body
LE: loop exit
PB: predicated region body
PF: predicated region fallthrough
CT: control target
= control target key end

     0   :  { %21 = vsyncpa [#allocation3], 0  ;;  %v1777_v1 = vmov 0.0   ;;  %vm1778_vm0 = vmmov 0   ;;  %vm79_vm1 = vcmask 261120   ;;  %s2151_s0 = inlined_call_operand.vmem [shape: bf16[16,32], index: 0, kind: input, shape index: {}]   ;;  %s2152_s1 = inlined_call_operand.vmem [shape: bf16[16,16], index: 1, kind: input, shape index: {}]   ;;  %s2153_s2 = inlined_call_operand.vmem [shape: bf16[32,16], index: 2, kind: input, shape index: {}]   ;;  %s2154_s3 = inlined_call_operand.vmem [shape: f32[1,16], index: 3, kind: input, shape index: {}]   ;;  %s2155_s4 = inlined_call_operand.vmem [shape: bf16[16,8], index: 4, kind: input, shape index: {}]   ;;  %s2156_s5 = inlined_call_operand.vmem [shape: f32[1,8], index: 5, kind: input, shape index: {}]   ;;  %s2157_s6 = inlined_call_operand.vmem [shape: bf16[2,32,16], index: 6, kind: input, shape index: {}]   ;;  %s2158_s7 = inlined_call_operand.vmem [shape: bf16[32,4], index: 7, kind: input, shape index: {}]   ;;  %s2159_s8 = inlined_call_operand.vmem [shape: bf16[32,10], index: 8, kind: input, shape index: {}]   ;;  %s2160_s9 = inlined_call_operand.vmem [shape: f32[16,8], index: 9, kind: input, shape index: {}]   ;;  %s2161_s10 = inlined_call_operand.vmem [shape: f32[16,1], index: 10, kind: input, shape index: {}]   ;;  %s2162_s11 = inlined_call_operand.vmem [shape: f32[16,8], index: 11, kind: output, shape index: {0}]   ;;  %s2163_s12 = inlined_call_operand.vmem [shape: f32[16,8], index: 12, kind: output, shape index: {1}]   ;;  %s2164_s13 = inlined_call_operand.hbm [shape: f32[1,1], index: 13, kind: output, shape index: {2}]   ;;  %s2165_s14 = inlined_call_operand.hbm [shape: f32[1,1], index: 14, kind: output, shape index: {3}]   ;;  %s2166_s15 = inlined_call_operand.hbm [shape: f32[1,1], index: 15, kind: output, shape index: {4}]  }
   0x1   :  { %v1638_v0 = vld [vmem:[%s2153_s2 + $0x8] sm:$0xff]   ;;  %1530 = vmatprep.subr.bf16.mxu0 %v1777_v1  ;;  %1538 = vmatprep.subr.bf16.mxu1 %v1777_v1  ;;  %v1639_v2 = vld [vmem:[%s2153_s2] sm:$0xff]  }
   0x2   :  { %1531 = vmatpush3.bf16.msra.mxu0 %v1638_v0  ;;  %1534 = vmatprep.mubr.msk.bf16.mxu0 %vm1778_vm0, %v1777_v1  ;;  %v1883_v3 = vld [vmem:[%s2151_s0] sm:$0xff]  }
   0x3   :  { %1532 = vmatprep.subr.bf16.mxu0 %v1777_v1  ;;  %1540 = vmatprep.mubr.msk.bf16.mxu1 %vm1778_vm0, %v1777_v1 }
   0x6   :  { %1533 = vmatpush3.bf16.msra.mxu0 %v1639_v2 }
   0x7   :  { %1550 = vmatprep.subr.bf16.mxu0 %v1777_v1 }
   0x9   :  { %1535 = vmatmul.mubr.msk.bf16.vlgmr.msra.gmra.mxu0 %vm79_vm1, %v1883_v3 }
   0xa   :  { %22 = vsyncpa [#allocation5], 0  ;;  %1552 = vmatprep.mubr.msk.bf16.mxu0 %vm1778_vm0, %v1777_v1  ;;  %v1895_v6 = vld [vmem:[%s2152_s1] sm:$0xf]  ;;  %v1900_v7 = vld [vmem:[%s2152_s1 + $0x4] sm:$0xf] }
   0xb   :  { %v1472_v11 = vcombine.low %v1895_v6, %v1900_v7  ;;  %vm137_vm2 = vcmask 130048   ;;  %v1642_v12 = vld [vmem:[%s2155_s4] sm:$0xff]   ;;  %v1643_v22 = vld [vmem:[%s2158_s7 + $0x8] sm:$0xff]   ;;  %v1779_v25 = vmov 1   ;;  %s1780_s17 = smov 126   ;;  %s1781_s20 = smov 125  }
   0xc   :  { %v1471_v13 = vld [vmem:[%s2154_s3] ss:$0 sm:$0xff]  ;;  %1626 = vset.pattern.permute.xlu1 %v1779_v25  ;;  %1628 = vset.pattern.permute.xlu0 %v1779_v25  ;;  %v1645_v31 = vld [vmem:[%s2157_s6 + $0x8] sm:$0xff]   ;;  %v1782_v42 = vmov 0   ;;  %v1647_v43 = vld [vmem:[%s2157_s6 + $0x18] sm:$0xff]   ;;  %vm286_vm3 = vcmask 64512  }
   0xd   :  { %v1644_v24 = vld [vmem:[%s2158_s7] sm:$0xff]   ;;  %v1648_v45 = vld [vmem:[%s2157_s6 + $0x10] sm:$0xff]   ;;  %vm56_vm4 = vcmp.gt.bf16.partialorder %v1895_v6, 0  ;;  %vm57_vm5 = vcmp.gt.bf16.partialorder %v1900_v7, 0  ;;  %s1783_s29 = smov 16   ;;  %s1786_s23 = smov [#allocation2]  }
   0xe   :  { %v1646_v38 = vld [vmem:[%s2157_s6] sm:$0xff]   ;;  %s1428_s2 = sshll.u32 %s1786_s23, 4  ;;  %s1429_s2 = int_to_ptr.vmem [resolvable:$true] %s1428_s2 }
   0xf   :  { %s1713_s6 = scalar_lea.vmem %s1429_s2, 16  ;;  %s1717_s24 = scalar_lea.vmem %s1429_s2, 32 }
  0x10   :  { %p1714_p0 = scmp.ne.s32.totalorder %s1429_s2, %s1713_s6  ;;  %p1718_p1 = scmp.lt.s32.totalorder %s1429_s2, %s1429_s2 }
  0x11   :  { %p1719_p2 = scmp.lt.s32.totalorder %s1717_s24, %s1713_s6 }
  0x13   :  { %p1720_p3 = por %p1719_p2, %p1718_p1 }
  0x15   :  { %p1721_p4 = pnand %p1720_p3, %p1714_p0 }
  0xc9   :  { %v117_v4 = vpop.f32.mrf.mxu0 }
  0xcb   :  { %v1536_v5 = vpop.f32.mrf.mxu0 }
  0xcd   :  { %v120_v8 = vpop.f32.mrf.mxu0 }
  0xce   :  { %v124_v9 = vpack.c.bf16 %v120_v8, %v117_v4 }
  0xcf   :  { %v1537_v10 = vpop.f32.mrf.mxu0 }
  0xd0   :  { %1539 = vmatpush3.bf16.msra.mxu1 %v124_v9 }
  0xd1   :  { %1544 = vmatprep.subr.bf16.mxu1 %v1777_v1 }
  0xd3   :  { %1541 = vmatmul.mubr.msk.bf16.vlgmr.msra.gmra.mxu1 %vm137_vm2, %v1472_v11 }
  0xd4   :  { %1546 = vmatprep.mubr.msk.bf16.mxu1 %vm1778_vm0, %v1777_v1  ;;  %1545 = vmatpush3.bf16.msra.mxu1 %v1642_v12 }
  0xd5   :  { %1556 = vmatprep.subr.bf16.mxu1 %v1777_v1 }
 0x193   :  { %v175_v14 = vpop.f32.mrf.mxu1 }
 0x194   :  { %v176_v16 = vadd.f32 %v1471_v13, %v175_v14 }
 0x195   :  { %v1542_v15 = vpop.f32.mrf.mxu1 }
 0x196   :  { %v182_v20 = vmax.f32 %v176_v16, 0.0 }
 0x197   :  { %v178_v17 = vpop.f32.mrf.mxu1 }
 0x198   :  { %v179_v18 = vadd.f32 %v1471_v13, %v178_v17 }
 0x199   :  { %v1543_v19 = vpop.f32.mrf.mxu1 }
 0x19a   :  { %v183_v21 = vmax.f32 %v179_v18, 0.0 }
 0x19c   :  { %v184_v23 = vpack.c.bf16 %v183_v21, %v182_v20 }
 0x19e   :  { %1547 = vmatmul.mubr.msk.bf16.vlgmr.msra.gmra.mxu1 %vm137_vm2, %v184_v23 }
 0x19f   :  { %1557 = vmatpush3.bf16.msra.mxu1 %v1643_v22  ;;  %1560 = vmatprep.mubr.msk.bf16.mxu1 %vm1778_vm0, %v1777_v1 }
 0x1a0   :  { %1558 = vmatprep.subr.bf16.mxu1 %v1777_v1 }
 0x1a3   :  { %1559 = vmatpush3.bf16.msra.mxu1 %v1644_v24 }
 0x1a4   :  { %1572 = vmatprep.subr.bf16.mxu1 %v1777_v1 }
 0x1a6   :  { %1561 = vmatmul.mubr.msk.bf16.vlgmr.msra.gmra.mxu1 %vm79_vm1, %v1883_v3 }
 0x1a7   :  { %1574 = vmatprep.mubr.msk.bf16.mxu1 %vm1778_vm0, %v1777_v1 }
 0x25e   :  { %v230_v26 = vpop.f32.mrf.mxu1 }
 0x260   :  { %v1548_v27 = vpop.f32.mrf.mxu1 }
 0x262   :  { %v233_v28 = vpop.f32.mrf.mxu1 }
 0x263   :  { %v237_v29 = vpack.c.bf16 %v233_v28, %v230_v26 }
 0x264   :  { %v1549_v30 = vpop.f32.mrf.mxu1 }
 0x265   :  { %1551 = vmatpush3.bf16.msra.mxu0 %v237_v29  ;;  %v535_v29 = vlaneseq }
 0x266   :  { %v410_v32 = vpop.f32.mrf.mxu1  ;;  %1564 = vmatprep.subr.bf16.mxu0 %v1777_v1 }
 0x267   :  { %v475_v33 = vsub.f32 0.0, %v410_v32  ;;  %v481_v34 = vmul.f32 -0.2, %v410_v32  ;;  %828 = vperm.xlu1 %1626, %v410_v32   ;;  %489 = vrot.lane.b32.xlu0 %v410_v32, %s1780_s17 }
 0x268   :  { %v1562_v35 = vpop.f32.mrf.mxu1  ;;  %1553 = vmatmul.mubr.msk.bf16.vlgmr.msra.gmra.mxu0 %vm137_vm2, %v1472_v11  ;;  %v1476_v11 = vld [vmem:[%s2156_s5] ss:$0 sm:$0xff] }
 0x269   :  { %v477_v36 = vmul.f32 1.442695, %v475_v33  ;;  %v483_v37 = vmul.f32 1.442695, %v481_v34  ;;  %1565 = vmatpush3.bf16.msra.mxu0 %v1645_v31  ;;  %1568 = vmatprep.mubr.msk.bf16.mxu0 %vm1778_vm0, %v1777_v1 }
 0x26a   :  { %v413_v39 = vpop.f32.mrf.mxu1  ;;  %1566 = vmatprep.subr.bf16.mxu0 %v1777_v1 }
 0x26b   :  { %1651 = vpow2.f32 %v477_v36  ;;  %v476_v40 = vsub.f32 0.0, %v413_v39  ;;  %789 = vrot.lane.b32.xlu0 %v410_v32, %s1781_s20  ;;  %491 = vrot.lane.b32.xlu1 %v413_v39, %s1780_s17  ;;  %v482_v46 = vmul.f32 -0.2, %v413_v39  ;;  %v653_v36 = vsel %vm56_vm4, 65537, %v1782_v42 }
 0x26c   :  { %1653 = vpow2.f32 %v483_v37  ;;  %v1563_v41 = vpop.f32.mrf.mxu1  ;;  %1627 = vset.pattern.permute.xlu1 %v1782_v42  ;;  %v654_v37 = vsel %vm57_vm5, 65537, %v1782_v42  ;;  %vm325_vm5 = vcmask 7168  }
 0x26d   :  { %1567 = vmatpush3.bf16.msra.mxu0 %v1646_v38  ;;  %v479_v44 = vmul.f32 1.442695, %v476_v40  ;;  %v485_v48 = vmul.f32 1.442695, %v482_v46  ;;  %v655_v41 = vunpack.c.l.b16 %v653_v36 }
 0x26e   :  { %1578 = vmatprep.subr.bf16.mxu0 %v1777_v1 }
 0x26f   :  { %832 = vperm.xlu0 %1628, %v413_v39   ;;  %791 = vrot.lane.b32.xlu1 %v413_v39, %s1781_s20  ;;  %1655 = vpow2.f32 %v479_v44  ;;  %vm2013_vm6 = vcmp.ne.s32.totalorder %v655_v41, 0 }
 0x270   :  { %1569 = vmatmul.mubr.msk.bf16.vlgmr.msra.gmra.mxu0 %vm79_vm1, %v1883_v3  ;;  %1657 = vpow2.f32 %v485_v48 }
 0x271   :  { %1579 = vmatpush3.bf16.msra.mxu0 %v1647_v43  ;;  %1582 = vmatprep.mubr.msk.bf16.mxu0 %vm1778_vm0, %v1777_v1  ;;  %v656_v43 = vunpack.c.l.b16 %v654_v37 }
 0x272   :  { %1580 = vmatprep.subr.bf16.mxu0 %v1777_v1 }
 0x273   :  { %532 = vperm.xlu1 %1627, %v413_v39   ;;  %vm2017_vm7 = vcmp.ne.s32.totalorder %v656_v43, 0 }
 0x275   :  { %1581 = vmatpush3.bf16.msra.mxu0 %v1648_v45 }
 0x276   :  { %1592 = vmatprep.subr.bf16.mxu0 %v1777_v1 }
 0x278   :  { %v1652_v47 = vpop.eup %1651  ;;  %1583 = vmatmul.mubr.msk.bf16.vlgmr.msra.gmra.mxu0 %vm79_vm1, %v1883_v3 }
 0x279   :  { %v1654_v49 = vpop.eup %1653  ;;  %545 = vrot.lane.b32.xlu0 %v1652_v47, %s1780_s17  ;;  %1596 = vmatprep.mubr.msk.bf16.mxu0 %vm1778_vm0, %v1777_v1 }
 0x27a   :  { %599 = vrot.lane.b32.xlu1 %v1654_v49, %s1780_s17 }
 0x27c   :  { %v1656_v50 = vpop.eup %1655 }
 0x27d   :  { %895 = vrot.lane.b32.xlu0 %v1654_v49, %s1781_s20  ;;  %v1658_v51 = vpop.eup %1657 }
 0x27e   :  { %843 = vrot.lane.b32.xlu1 %v1652_v47, %s1781_s20 }
 0x281   :  { %547 = vrot.lane.b32.xlu0 %v1656_v50, %s1780_s17 }
 0x282   :  { %584 = vperm.xlu1 %1627, %v1652_v47  }
 0x285   :  { %934 = vperm.xlu0 %1628, %v1654_v49  }
 0x286   :  { %638 = vperm.xlu1 %1627, %v1654_v49  }
 0x289   :  { %1630 = vset.pattern.permute.xlu0 %v1782_v42 }
 0x28a   :  { %601 = vrot.lane.b32.xlu1 %v1658_v51, %s1780_s17  ;;  %528 = vperm.xlu0 %1630, %v410_v32   ;;  %v536_v32 = vshrl.u32 %v535_v29, 7 }
 0x28b   :  { %1629 = vset.pattern.permute.xlu1 %v1779_v25 }
 0x28c   :  { %v2005_v34 = vsub.s32 0, %v536_v32 }
 0x28e   :  { %882 = vperm.xlu1 %1629, %v1652_v47   ;;  %845 = vrot.lane.b32.xlu0 %v1656_v50, %s1781_s20 }
 0x292   :  { %897 = vrot.lane.b32.xlu1 %v1658_v51, %s1781_s20  ;;  %588 = vperm.xlu0 %1630, %v1656_v50  }
 0x296   :  { %886 = vperm.xlu1 %1629, %v1656_v50   ;;  %642 = vperm.xlu0 %1630, %v1658_v51  }
 0x29a   :  { %938 = vperm.xlu1 %1629, %v1658_v51  }
 0x2d9   :  { %v490_v52 = vpop.permute.xlu0 %489 }
 0x2da   :  { %495 = vxpose.xlu0.b32.start [1/2] (short) (narrow) %v490_v52, 8 }
 0x2dd   :  { %v790_v54 = vpop.permute.xlu0 %789 }
 0x2e2   :  { %v1975_v53 = vpop.permute.xlu1 %828 }
 0x2e6   :  { %v492_v55 = vpop.permute.xlu1 %491 }
 0x2e7   :  { %496 = vxpose.xlu0.b32.end [2/2] (short) (narrow) %v492_v55, 8 }
 0x2ea   :  { %v1977_v56 = vpop.permute.xlu0 %832  ;;  %v792_v57 = vpop.permute.xlu1 %791 }
 0x2eb   :  { %795 = vxpose.xlu0.b32.start [1/2] (short) (narrow) %v790_v54, 8 }
 0x2ee   :  { %v546_v58 = vpop.permute.xlu0 %545  ;;  %v1979_v59 = vpop.permute.xlu1 %532 }
 0x2ef   :  { %551 = vxpose.xlu1.b32.start [1/2] (short) (narrow) %v546_v58, 8  ;;  %796 = vxpose.xlu0.b32.end [2/2] (short) (narrow) %v792_v57, 8 }
 0x2f2   :  { %v896_v60 = vpop.permute.xlu0 %895  ;;  %v600_v61 = vpop.permute.xlu1 %599 }
 0x2f3   :  { %605 = vxpose.xlu0.b32.start [1/2] (short) (narrow) %v600_v61, 8 }
 0x2f6   :  { %v548_v62 = vpop.permute.xlu0 %547  ;;  %v844_v63 = vpop.permute.xlu1 %843 }
 0x2f7   :  { %552 = vxpose.xlu1.b32.end [2/2] (short) (narrow) %v548_v62, 8 }
 0x2fb   :  { %849 = vxpose.xlu1.b32.start [1/2] (short) (narrow) %v844_v63, 8 }
 0x2fd   :  { %v585_v0 = vpop.permute.xlu1 %584 }
 0x300   :  { %v1981_v2 = vpop.permute.xlu0 %934 }
 0x301   :  { %v639_v3 = vpop.permute.xlu1 %638 }
 0x305   :  { %v602_v4 = vpop.permute.xlu1 %601  ;;  %v529_v5 = vpop.permute.xlu0 %528 }
 0x306   :  { %606 = vxpose.xlu0.b32.end [2/2] (short) (narrow) %v602_v4, 8 }
 0x309   :  { %v1983_v8 = vpop.permute.xlu1 %882  ;;  %v846_v9 = vpop.permute.xlu0 %845 }
 0x30a   :  { %901 = vxpose.xlu0.b32.start [1/2] (short) (narrow) %v896_v60, 8  ;;  %850 = vxpose.xlu1.b32.end [2/2] (short) (narrow) %v846_v9, 8 }
 0x30d   :  { %v898_v10 = vpop.permute.xlu1 %897  ;;  %v589_v28 = vpop.permute.xlu0 %588 }
 0x30e   :  { %902 = vxpose.xlu0.b32.end [2/2] (short) (narrow) %v898_v10, 8 }
 0x311   :  { %v887_v30 = vpop.permute.xlu1 %886  ;;  %v643_v31 = vpop.permute.xlu0 %642 }
 0x315   :  { %v939_v33 = vpop.permute.xlu1 %938 }
 0x328   :  { %v279_v12 = vpop.f32.mrf.mxu0 }
 0x329   :  { %v1988_v13 = vadd.f32 %v1476_v11, %v279_v12 }
 0x32a   :  { %v1554_v14 = vpop.f32.mrf.mxu0 }
 0x32b   :  { %287 = vst.msk [vmem:[%s2162_s11] sm:$0xff] %vm286_vm3, %v1988_v13 }
 0x32c   :  { %v282_v15 = vpop.f32.mrf.mxu0 }
 0x32d   :  { %v1995_v16 = vadd.f32 %v1476_v11, %v282_v15 }
 0x32e   :  { %v1555_v17 = vpop.f32.mrf.mxu0 }
 0x32f   :  { %288 = vst.msk [vmem:[%s2162_s11 + $0x8] sm:$0xff] %vm286_vm3, %v1995_v16 }
 0x330   :  { %v467_v18 = vpop.f32.mrf.mxu0 }
 0x332   :  { %v1570_v19 = vpop.f32.mrf.mxu0 }
 0x334   :  { %v470_v20 = vpop.f32.mrf.mxu0 }
 0x335   :  { %v474_v21 = vpack.c.bf16 %v470_v20, %v467_v18  ;;  %v1649_v18 = vld [vmem:[%s2159_s8 + $0x8] sm:$0xff]  }
 0x336   :  { %v1571_v22 = vpop.f32.mrf.mxu0  ;;  %1593 = vmatpush3.bf16.msra.mxu0 %v1649_v18 }
 0x337   :  { %1573 = vmatpush3.bf16.msra.mxu1 %v474_v21  ;;  %1594 = vmatprep.subr.bf16.mxu0 %v1777_v1 }
 0x338   :  { %v781_v23 = vpop.f32.mrf.mxu0  ;;  %1586 = vmatprep.subr.bf16.mxu1 %v1777_v1 }
 0x33a   :  { %v1584_v24 = vpop.f32.mrf.mxu0 }
 0x33c   :  { %v784_v25 = vpop.f32.mrf.mxu0 }
 0x33d   :  { %v788_v26 = vpack.c.bf16 %v784_v25, %v781_v23 }
 0x33e   :  { %v1585_v27 = vpop.f32.mrf.mxu0 }
 0x35f   :  { %v511_v35 = vpop.trf.xlu0 }
 0x360   :  { %v538_v38 = vrot.slane %v511_v35, %v2005_v34 }
 0x362   :  { %v539_v45 = vadd.f32 %v538_v38, %v529_v5  ;;  %v540_v6 = vadd.f32 %v538_v38, %v1979_v59 }
 0x364   :  { %vm541_vm8 = vcmp.gt.f32.partialorder %v539_v45, 0.0  ;;  %vm542_vm9 = vcmp.gt.f32.partialorder %v540_v6, 0.0 }
 0x367   :  { %v811_v39 = vpop.trf.xlu0 }
 0x368   :  { %v838_v52 = vrot.slane %v811_v39, %v2005_v34  ;;  %v1650_v39 = vld [vmem:[%s2159_s8] sm:$0xff]   ;;  %s1785_s8 = smov 119  }
 0x369   :  { %1595 = vmatpush3.bf16.msra.mxu0 %v1650_v39 }
 0x36a   :  { %v839_v62 = vadd.f32 %v838_v52, %v1975_v53  ;;  %v840_v63 = vadd.f32 %v838_v52, %v1977_v56 }
 0x36c   :  { %vm841_vm10 = vcmp.gt.f32.partialorder %v839_v62, 0.0  ;;  %vm842_vm11 = vcmp.gt.f32.partialorder %v840_v63, 0.0 }
 0x36f   :  { %v567_v40 = vpop.trf.xlu1 }
 0x370   :  { %v594_v44 = vrot.slane %v567_v40, %v2005_v34 }
 0x372   :  { %v595_v48 = vmul.f32 %v594_v44, %v585_v0  ;;  %v596_v49 = vmul.f32 %v594_v44, %v589_v28 }
 0x37e   :  { %v621_v7 = vpop.trf.xlu0 }
 0x37f   :  { %v648_v46 = vrot.slane %v621_v7, %v2005_v34 }
 0x381   :  { %v649_v50 = vmul.f32 %v648_v46, %v639_v3  ;;  %v650_v51 = vmul.f32 %v648_v46, %v643_v31 }
 0x382   :  { %v865_v54 = vpop.trf.xlu1 }
 0x383   :  { %v651_v55 = vsel %vm541_vm8, %v595_v48, %v649_v50  ;;  %v652_v57 = vsel %vm542_vm9, %v596_v49, %v650_v51  ;;  %v892_v61 = vrot.slane %v865_v54, %v2005_v34 }
 0x384   :  { %v659_v58 = vsel %vm2013_vm6, %v651_v55, 0.0  ;;  %v660_v59 = vsel %vm2017_vm7, %v652_v57, 0.0 }
 0x385   :  { %v669_v60 = vpack.c.bf16 %v660_v59, %v659_v58  ;;  %v893_v4 = vmul.f32 %v892_v61, %v1983_v8  ;;  %v894_v5 = vmul.f32 %v892_v61, %v887_v30  ;;  %v664_v17 = vsel %vm137_vm2, %v660_v59, 0.0 }
 0x386   :  { %v917_v0 = vpop.trf.xlu0 }
 0x387   :  { %v944_v3 = vrot.slane %v917_v0, %v2005_v34  ;;  %1575 = vmatmul.mubr.msk.bf16.vlgmr.msra.gmra.mxu1 %vm137_vm2, %v669_v60 }
 0x388   :  { %1587 = vmatpush3.bf16.msra.mxu1 %v788_v26  ;;  %1588 = vmatprep.mubr.msk.bf16.mxu1 %vm1778_vm0, %v1777_v1 }
 0x389   :  { %v945_v9 = vmul.f32 %v944_v3, %v1981_v2  ;;  %v946_v10 = vmul.f32 %v944_v3, %v939_v33  ;;  %1600 = vmatprep.subr.bf16.mxu1 %v1777_v1  ;;  %v661_v2 = vsel %vm137_vm2, %v659_v58, 0.0 }
 0x38b   :  { %v948_v53 = vsel %vm842_vm11, %v894_v5, %v946_v10  ;;  %v947_v56 = vsel %vm841_vm10, %v893_v4, %v945_v9 }
 0x38c   :  { %v950_v11 = vsel %vm2017_vm7, %v948_v53, 0.0  ;;  %v949_v12 = vsel %vm2013_vm6, %v947_v56, 0.0 }
 0x38d   :  { %v954_v14 = vsel %vm137_vm2, %v950_v11, 0.0  ;;  %v951_v8 = vsel %vm137_vm2, %v949_v12, 0.0  ;;  %v959_v15 = vpack.c.bf16 %v950_v11, %v949_v12  ;;  %v1784_v12 = vmov 8  }
 0x38e   :  { %955 = vadd.xlane.f32.xlu0 %v954_v14  ;;  %952 = vadd.xlane.f32.xlu1 %v951_v8 }
 0x38f   :  { %1589 = vmatmul.mubr.msk.bf16.vlgmr.msra.gmra.mxu1 %vm137_vm2, %v959_v15  ;;  %1637 = vset.pattern.permute.xlu0 %v1784_v12 }
 0x390   :  { %1602 = vmatprep.mubr.msk.bf16.mxu1 %vm1778_vm0, %v1777_v1  ;;  %1636 = vset.pattern.permute.xlu1 %v1784_v12 }
 0x392   :  { %662 = vadd.xlane.f32.xlu1 %v661_v2 }
 0x396   :  { %665 = vadd.xlane.f32.xlu1 %v664_v17 }
 0x417   :  { %v953_v19 = vpop.xlane.xlu1 %952  ;;  %v956_v21 = vpop.xlane.xlu0 %955 }
 0x418   :  { %v957_v20 = vmax.f32 %v953_v19, 1e-12  ;;  %v958_v22 = vmax.f32 %v956_v21, 1e-12 }
 0x41a   :  { %1659 = vrcp.f32 %v957_v20 }
 0x41b   :  { %1661 = vrcp.f32 %v958_v22  ;;  %v663_v46 = vpop.xlane.xlu1 %662 }
 0x41c   :  { %v667_v49 = vmax.f32 %v663_v46, 1e-12 }
 0x41f   :  { %v666_v48 = vpop.xlane.xlu1 %665 }
 0x420   :  { %v668_v50 = vmax.f32 %v666_v48, 1e-12 }
 0x427   :  { %v1660_v27 = vpop.eup %1659 }
 0x428   :  { %v1662_v32 = vpop.eup %1661 }
 0x447   :  { %v707_v23 = vpop.f32.mrf.mxu1 }
 0x449   :  { %v1576_v24 = vpop.f32.mrf.mxu1 }
 0x44b   :  { %v710_v25 = vpop.f32.mrf.mxu1 }
 0x44d   :  { %v1577_v26 = vpop.f32.mrf.mxu1 }
 0x44f   :  { %v997_v28 = vpop.f32.mrf.mxu1 }
 0x450   :  { %v1006_v29 = vmul.f32 %v1660_v27, %v997_v28 }
 0x451   :  { %v1590_v30 = vpop.f32.mrf.mxu1 }
 0x452   :  { %v1010_v31 = vmin.f32 %v1006_v29, 0.0  ;;  %vm1008_vm12 = vcmp.gt.f32.partialorder %v1006_v29, 0.0 }
 0x453   :  { %v1000_v33 = vpop.f32.mrf.mxu1 }
 0x454   :  { %v1012_v35 = vmul.f32 1.442695, %v1010_v31  ;;  %v1007_v36 = vmul.f32 %v1662_v32, %v1000_v33 }
 0x455   :  { %v1591_v1 = vpop.f32.mrf.mxu1 }
 0x456   :  { %1663 = vpow2.f32 %v1012_v35  ;;  %v1011_v37 = vmin.f32 %v1007_v36, 0.0  ;;  %vm1009_vm13 = vcmp.gt.f32.partialorder %v1007_v36, 0.0 }
 0x458   :  { %v1014_v38 = vmul.f32 1.442695, %v1011_v37 }
 0x45a   :  { %1665 = vpow2.f32 %v1014_v38 }
 0x45b   :  { %1667 = vrcp.f32 %v667_v49 }
 0x45c   :  { %1669 = vrcp.f32 %v668_v50 }
 0x463   :  { %v1664_v40 = vpop.eup %1663 }
 0x464   :  { %v1495_v41 = vadd.f32 -1.0, %v1664_v40 }
 0x466   :  { %v1018_v45 = vsel %vm1008_vm12, %v1006_v29, %v1495_v41 }
 0x467   :  { %v1666_v43 = vpop.eup %1665 }
 0x468   :  { %v1496_v44 = vadd.f32 -1.0, %v1666_v43  ;;  %v1668_v51 = vpop.eup %1667 }
 0x469   :  { %v1670_v52 = vpop.eup %1669  ;;  %v716_v54 = vmul.f32 %v1668_v51, %v707_v23 }
 0x46a   :  { %v1019_v6 = vsel %vm1009_vm13, %v1007_v36, %v1496_v44  ;;  %v717_v55 = vmul.f32 %v1670_v52, %v710_v25 }
 0x46b   :  { %v1631_v7 = vpack.i.bf16 %v1019_v6, %v1018_v45  ;;  %v720_v57 = vmin.f32 %v716_v54, 0.0  ;;  %vm718_vm14 = vcmp.gt.f32.partialorder %v716_v54, 0.0 }
 0x46c   :  { %v721_v58 = vmin.f32 %v717_v55, 0.0  ;;  %vm719_vm15 = vcmp.gt.f32.partialorder %v717_v55, 0.0 }
 0x46d   :  { %1632 = vrot.lane.b32.xlu1 %v1631_v7, %s1783_s29  ;;  %v722_v59 = vmul.f32 1.442695, %v720_v57 }
 0x46e   :  { %v724_v60 = vmul.f32 1.442695, %v721_v58 }
 0x46f   :  { %1671 = vpow2.f32 %v722_v59 }
 0x470   :  { %1673 = vpow2.f32 %v724_v60 }
 0x47c   :  { %v1672_v61 = vpop.eup %1671 }
 0x47d   :  { %v1674_v62 = vpop.eup %1673  ;;  %v1485_v63 = vadd.f32 -1.0, %v1672_v61 }
 0x47e   :  { %v1486_v0 = vadd.f32 -1.0, %v1674_v62 }
 0x47f   :  { %v728_v9 = vsel %vm718_vm14, %v716_v54, %v1485_v63  ;;  %v292_v63 = vsel %vm286_vm3, %v1995_v16, -inf }
 0x480   :  { %v729_v10 = vsel %vm719_vm15, %v717_v55, %v1486_v0 }
 0x4df   :  { %v1633_v3 = vpop.permute.xlu1 %1632 }
 0x4e0   :  { %v1635_v4 = vunpack.i.h.bf16 %v1633_v3  ;;  %v1634_v5 = vunpack.i.l.bf16 %v1633_v3 }
 0x4e2   :  { %v1029_v53 = vsel %vm137_vm2, %v729_v10, %v1635_v4  ;;  %v1028_v56 = vsel %vm137_vm2, %v728_v9, %v1634_v5 }
 0x4e3   :  { %v1030_v11 = vpack.c.bf16 %v1029_v53, %v1028_v56 }
 0x4e5   :  { %1597 = vmatmul.mubr.msk.bf16.vlgmr.msra.gmra.mxu0 %vm79_vm1, %v1030_v11 }
 0x5a5   :  { %v1084_v14 = vpop.f32.mrf.mxu0 }
 0x5a6   :  { %v1092_v8 = vsub.f32 0.0, %v1084_v14  ;;  %v1098_v15 = vmul.f32 -0.2, %v1084_v14  ;;  %1106 = vrot.lane.b32.xlu0 %v1084_v14, %s1785_s8 }
 0x5a7   :  { %v1598_v2 = vpop.f32.mrf.mxu0 }
 0x5a8   :  { %v1094_v17 = vmul.f32 1.442695, %v1092_v8  ;;  %v1100_v18 = vmul.f32 1.442695, %v1098_v15 }
 0x5a9   :  { %v1087_v19 = vpop.f32.mrf.mxu0 }
 0x5aa   :  { %1675 = vpow2.f32 %v1094_v17  ;;  %v1093_v20 = vsub.f32 0.0, %v1087_v19  ;;  %v1099_v21 = vmul.f32 -0.2, %v1087_v19  ;;  %1108 = vrot.lane.b32.xlu0 %v1087_v19, %s1785_s8  ;;  %v1091_v22 = vpack.c.bf16 %v1087_v19, %v1084_v14 }
 0x5ab   :  { %v1599_v23 = vpop.f32.mrf.mxu0  ;;  %1677 = vpow2.f32 %v1100_v18 }
 0x5ac   :  { %v1102_v24 = vmul.f32 1.442695, %v1099_v21  ;;  %1601 = vmatpush3.bf16.msra.mxu1 %v1091_v22  ;;  %v1096_v25 = vmul.f32 1.442695, %v1093_v20 }
 0x5ae   :  { %1679 = vpow2.f32 %v1102_v24 }
 0x5af   :  { %1681 = vpow2.f32 %v1096_v25 }
 0x5b7   :  { %v1676_v26 = vpop.eup %1675 }
 0x5b8   :  { %1162 = vrot.lane.b32.xlu1 %v1676_v26, %s1785_s8  ;;  %v1678_v27 = vpop.eup %1677 }
 0x5bb   :  { %v1680_v28 = vpop.eup %1679 }
 0x5bc   :  { %1216 = vrot.lane.b32.xlu1 %v1678_v27, %s1785_s8  ;;  %1218 = vrot.lane.b32.xlu0 %v1680_v28, %s1785_s8  ;;  %v1682_v29 = vpop.eup %1681 }
 0x5c0   :  { %1164 = vrot.lane.b32.xlu1 %v1682_v29, %s1785_s8  ;;  %1149 = vperm.xlu0 %1637, %v1087_v19  }
 0x5c4   :  { %1145 = vperm.xlu1 %1636, %v1084_v14   ;;  %1255 = vperm.xlu0 %1637, %v1678_v27  }
 0x5c8   :  { %1201 = vperm.xlu1 %1636, %v1676_v26  }
 0x5cc   :  { %1205 = vperm.xlu1 %1636, %v1682_v29  }
 0x5d0   :  { %1259 = vperm.xlu1 %1636, %v1680_v28  }
 0x618   :  { %v1107_v30 = vpop.permute.xlu0 %1106 }
 0x619   :  { %1112 = vxpose.xlu0.b32.start [1/2] (short) (narrow) %v1107_v30, 8 }
 0x61c   :  { %v1109_v31 = vpop.permute.xlu0 %1108 }
 0x61d   :  { %1113 = vxpose.xlu0.b32.end [2/2] (short) (narrow) %v1109_v31, 8 }
 0x62a   :  { %v1163_v32 = vpop.permute.xlu1 %1162 }
 0x62b   :  { %1168 = vxpose.xlu1.b32.start [1/2] (short) (narrow) %v1163_v32, 8 }
 0x62e   :  { %v1217_v33 = vpop.permute.xlu1 %1216  ;;  %v1219_v35 = vpop.permute.xlu0 %1218 }
 0x62f   :  { %1222 = vxpose.xlu0.b32.start [1/2] (short) (narrow) %v1217_v33, 8 }
 0x632   :  { %v1165_v36 = vpop.permute.xlu1 %1164 }
 0x633   :  { %1223 = vxpose.xlu0.b32.end [2/2] (short) (narrow) %v1219_v35, 8  ;;  %1169 = vxpose.xlu1.b32.end [2/2] (short) (narrow) %v1165_v36, 8 }
 0x63b   :  { %v1150_v37 = vpop.permute.xlu0 %1149 }
 0x63f   :  { %v1146_v1 = vpop.permute.xlu1 %1145  ;;  %v1256_v39 = vpop.permute.xlu0 %1255 }
 0x643   :  { %v1202_v38 = vpop.permute.xlu1 %1201 }
 0x647   :  { %v1206_v40 = vpop.permute.xlu1 %1205 }
 0x64b   :  { %v1260_v43 = vpop.permute.xlu1 %1259 }
 0x695   :  { %v1128_v41 = vpop.trf.xlu0 }
 0x696   :  { %v1155_v44 = vrot.slane %v1128_v41, %v2005_v34 }
 0x698   :  { %v1156_v45 = vadd.f32 %v1155_v44, %v1146_v1  ;;  %v1157_v6 = vadd.f32 %v1155_v44, %v1150_v37 }
 0x69a   :  { %vm1158_vm0 = vcmp.gt.f32.partialorder %v1156_v45, 0.0  ;;  %vm1159_vm1 = vcmp.gt.f32.partialorder %v1157_v6, 0.0 }
 0x6ab   :  { %v1238_v7 = vpop.trf.xlu0  ;;  %v1184_v46 = vpop.trf.xlu1 }
 0x6ac   :  { %v1265_v48 = vrot.slane %v1238_v7, %v2005_v34  ;;  %v1211_v49 = vrot.slane %v1184_v46, %v2005_v34  ;;  %v289_v34 = vsel %vm286_vm3, %v1988_v13, -inf }
 0x6ae   :  { %v1266_v50 = vmul.f32 %v1265_v48, %v1256_v39  ;;  %v1267_v51 = vmul.f32 %v1265_v48, %v1260_v43  ;;  %v1212_v52 = vmul.f32 %v1211_v49, %v1202_v38  ;;  %v1213_v54 = vmul.f32 %v1211_v49, %v1206_v40 }
 0x6b0   :  { %v1269_v55 = vsel %vm1159_vm1, %v1213_v54, %v1267_v51  ;;  %v1268_v57 = vsel %vm1158_vm0, %v1212_v52, %v1266_v50  ;;  %v52_v51 = vld [vmem:[%s2160_s9] sm:$0xff] }
 0x6b1   :  { %v1271_v58 = vsel %vm2017_vm7, %v1269_v55, 0.0  ;;  %v1270_v59 = vsel %vm2013_vm6, %v1268_v57, 0.0 }
 0x6b2   :  { %v1275_v60 = vsel %vm137_vm2, %v1271_v58, 0.0  ;;  %v1272_v61 = vsel %vm137_vm2, %v1270_v59, 0.0  ;;  %v1280_v62 = vpack.c.bf16 %v1271_v58, %v1270_v59  ;;  %v53_v58 = vld [vmem:[%s2160_s9 + $0x8] sm:$0xff] }
 0x6b3   :  { %1276 = vadd.xlane.f32.xlu1 %v1275_v60  ;;  %1273 = vadd.xlane.f32.xlu0 %v1272_v61 }
 0x6b4   :  { %1603 = vmatmul.mubr.msk.bf16.vlgmr.msra.gmra.mxu1 %vm137_vm2, %v1280_v62  ;;  %v2112_v62 = vld [vmem:[%s2161_s10] sm:$0xff] }
 0x6b7   :  { %290 = vmax.xlane.f32.xlu1 %v289_v34  ;;  %293 = vmax.xlane.f32.xlu0 %v292_v63  ;;  %v326_v34 = vsel %vm325_vm5, %v2112_v62, 0.0 }
 0x73c   :  { %v1274_v42 = vpop.xlane.xlu0 %1273  ;;  %v1277_v0 = vpop.xlane.xlu1 %1276 }
 0x73d   :  { %v1278_v47 = vmax.f32 %v1274_v42, 1e-12  ;;  %v1279_v3 = vmax.f32 %v1277_v0, 1e-12 }
 0x73f   :  { %1683 = vrcp.f32 %v1278_v47 }
 0x740   :  { %1685 = vrcp.f32 %v1279_v3  ;;  %v291_v9 = vpop.xlane.xlu1 %290  ;;  %v294_v8 = vpop.xlane.xlu0 %293 }
 0x741   :  { %v295_v12 = vsub.f32 %v1988_v13, %v291_v9  ;;  %v296_v20 = vsub.f32 %v1995_v16, %v294_v8 }
 0x743   :  { %v297_v19 = vmul.f32 1.442695, %v295_v12  ;;  %v299_v22 = vmul.f32 1.442695, %v296_v20 }
 0x74c   :  { %v1684_v4 = vpop.eup %1683 }
 0x74d   :  { %v1686_v11 = vpop.eup %1685 }
 0x774   :  { %v1318_v5 = vpop.f32.mrf.mxu1 }
 0x775   :  { %v1327_v10 = vmul.f32 %v1684_v4, %v1318_v5 }
 0x776   :  { %v1604_v53 = vpop.f32.mrf.mxu1 }
 0x777   :  { %v1331_v56 = vmin.f32 %v1327_v10, 0.0  ;;  %vm1329_vm2 = vcmp.gt.f32.partialorder %v1327_v10, 0.0 }
 0x778   :  { %v1321_v14 = vpop.f32.mrf.mxu1 }
 0x779   :  { %v1333_v15 = vmul.f32 1.442695, %v1331_v56  ;;  %v1328_v2 = vmul.f32 %v1686_v11, %v1321_v14 }
 0x77a   :  { %v1605_v17 = vpop.f32.mrf.mxu1 }
 0x77b   :  { %1687 = vpow2.f32 %v1333_v15  ;;  %v1332_v18 = vmin.f32 %v1328_v2, 0.0  ;;  %vm1330_vm4 = vcmp.gt.f32.partialorder %v1328_v2, 0.0 }
 0x77d   :  { %v1335_v21 = vmul.f32 1.442695, %v1332_v18 }
 0x77f   :  { %1689 = vpow2.f32 %v1335_v21 }
 0x780   :  { %1691 = vpow2.f32 %v297_v19 }
 0x781   :  { %1693 = vpow2.f32 %v299_v22 }
 0x788   :  { %v1688_v23 = vpop.eup %1687 }
 0x789   :  { %v1501_v24 = vadd.f32 -1.0, %v1688_v23 }
 0x78b   :  { %v2073_v25 = vsel %vm1329_vm2, %v1327_v10, %v1501_v24 }
 0x78c   :  { %v1690_v26 = vpop.eup %1689  ;;  %v1343_v27 = vsel %vm286_vm3, %v2073_v25, -inf  ;;  %1341 = vst.msk [vmem:[%s2163_s12] sm:$0xff] %vm286_vm3, %v2073_v25 }
 0x78d   :  { %v1692_v28 = vpop.eup %1691  ;;  %1344 = vmax.xlane.f32.xlu1 %v1343_v27  ;;  %v1502_v29 = vadd.f32 -1.0, %v1690_v26 }
 0x78e   :  { %v301_v31 = vsel %vm286_vm3, %v1692_v28, 0.0  ;;  %v1694_v33 = vpop.eup %1693 }
 0x78f   :  { %v2082_v30 = vsel %vm1330_vm4, %v1328_v2, %v1502_v29  ;;  %v304_v35 = vsel %vm286_vm3, %v1694_v33, 0.0 }
 0x790   :  { %v1346_v32 = vsel %vm286_vm3, %v2082_v30, -inf  ;;  %1342 = vst.msk [vmem:[%s2163_s12 + $0x8] sm:$0xff] %vm286_vm3, %v2082_v30 }
 0x791   :  { %302 = vadd.xlane.f32.xlu1 %v301_v31  ;;  %1347 = vmax.xlane.f32.xlu0 %v1346_v32 }
 0x795   :  { %305 = vadd.xlane.f32.xlu0 %v304_v35 }
 0x816   :  { %v1345_v36 = vpop.xlane.xlu1 %1344 }
 0x817   :  { %v1349_v1 = vsub.f32 %v2073_v25, %v1345_v36 }
 0x819   :  { %v1351_v37 = vmul.f32 1.442695, %v1349_v1 }
 0x81a   :  { %v303_v38 = vpop.xlane.xlu1 %302  ;;  %v2094_v39 = vpop.xlane.xlu0 %1347 }
 0x81b   :  { %1695 = vpow2.f32 %v1351_v37  ;;  %v1350_v40 = vsub.f32 %v2082_v30, %v2094_v39 }
 0x81c   :  { %1697 = vlog2.f32 %v303_v38 }
 0x81d   :  { %v1353_v41 = vmul.f32 1.442695, %v1350_v40 }
 0x81e   :  { %v306_v43 = vpop.xlane.xlu0 %305 }
 0x81f   :  { %1699 = vpow2.f32 %v1353_v41 }
 0x820   :  { %1701 = vlog2.f32 %v306_v43 }
 0x828   :  { %v1696_v44 = vpop.eup %1695 }
 0x829   :  { %v1698_v45 = vpop.eup %1697  ;;  %v1355_v6 = vsel %vm286_vm3, %v1696_v44, 0.0 }
 0x82a   :  { %v308_v7 = vmul.f32 0.6931472, %v1698_v45  ;;  %1356 = vadd.xlane.f32.xlu1 %v1355_v6 }
 0x82c   :  { %v1700_v46 = vpop.eup %1699  ;;  %v311_v48 = vadd.f32 %v308_v7, %v291_v9 }
 0x82d   :  { %v1702_v49 = vpop.eup %1701  ;;  %v1358_v50 = vsel %vm286_vm3, %v1700_v46, 0.0 }
 0x82e   :  { %v310_v52 = vmul.f32 0.6931472, %v1702_v49  ;;  %1359 = vadd.xlane.f32.xlu0 %v1358_v50  ;;  %v313_v54 = vsub.f32 %v1988_v13, %v311_v48  ;;  %v2117_v13 = vld [vmem:[%s2161_s10 + $0x8] sm:$0xff] }
 0x82f   :  { %v327_v63 = vsel %vm325_vm5, %v2117_v13, 0.0 }
 0x830   :  { %v312_v55 = vadd.f32 %v310_v52, %v294_v8  ;;  %v315_v57 = vmul.f32 %v313_v54, %v52_v51  ;;  %v328_v42 = vadd.f32 %v327_v63, %v326_v34 }
 0x832   :  { %v317_v59 = vsel %vm286_vm3, %v315_v57, 0.0  ;;  %v314_v60 = vsub.f32 %v1995_v16, %v312_v55 }
 0x833   :  { %318 = vadd.xlane.f32.xlu1 %v317_v59 }
 0x834   :  { %v316_v61 = vmul.f32 %v314_v60, %v53_v58 }
 0x836   :  { %v320_v16 = vsel %vm286_vm3, %v316_v61, 0.0 }
 0x837   :  { %321 = vadd.xlane.f32.xlu0 %v320_v16  ;;  %329 = vadd.xlane.f32.xlu1 %v328_v42 }
 0x8b3   :  { %v1357_v47 = vpop.xlane.xlu1 %1356 }
 0x8b4   :  { %1703 = vlog2.f32 %v1357_v47 }
 0x8b5   :  { %1705 = vrcp.f32 %v1357_v47 }
 0x8b7   :  { %v1360_v0 = vpop.xlane.xlu0 %1359 }
 0x8b8   :  { %1707 = vlog2.f32 %v1360_v0 }
 0x8b9   :  { %1709 = vrcp.f32 %v1360_v0 }
 0x8bc   :  { %v319_v3 = vpop.xlane.xlu1 %318 }
 0x8bd   :  { %v323_v4 = vsub.f32 0.0, %v319_v3 }
 0x8bf   :  { %v342_v10 = vmul.f32 %v323_v4, %v2112_v62 }
 0x8c0   :  { %v322_v5 = vpop.xlane.xlu0 %321  ;;  %v330_v56 = vpop.xlane.xlu1 %329 }
 0x8c1   :  { %v1704_v9 = vpop.eup %1703  ;;  %v324_v53 = vsub.f32 0.0, %v322_v5  ;;  %v331_v12 = vrot.slane %v330_v56, 4  ;;  %v344_v18 = vsel %vm325_vm5, %v342_v10, 0.0 }
 0x8c2   :  { %v1362_v11 = vmul.f32 0.6931472, %v1704_v9  ;;  %v1706_v8 = vpop.eup %1705 }
 0x8c3   :  { %v343_v14 = vmul.f32 %v324_v53, %v2117_v13  ;;  %v332_v2 = vadd.f32 %v331_v12, %v330_v56  ;;  %v1398_v29 = vmul.f32 %v1706_v8, %v1696_v44 }
 0x8c4   :  { %v1365_v15 = vadd.f32 %v1362_v11, %v1345_v36 }
 0x8c5   :  { %v1708_v17 = vpop.eup %1707  ;;  %v345_v19 = vsel %vm325_vm5, %v343_v14, 0.0  ;;  %v333_v24 = vrot.slane %v332_v2, 2  ;;  %v1400_v37 = vmul.f32 %v1398_v29, %v313_v54 }
 0x8c6   :  { %v1710_v20 = vpop.eup %1709  ;;  %v1364_v21 = vmul.f32 0.6931472, %v1708_v17  ;;  %v346_v22 = vadd.f32 %v345_v19, %v344_v18  ;;  %v1367_v23 = vsub.f32 %v2073_v25, %v1365_v15 }
 0x8c7   :  { %v1399_v26 = vmul.f32 %v1710_v20, %v1700_v46  ;;  %v334_v31 = vadd.f32 %v333_v24, %v332_v2 }
 0x8c8   :  { %347 = vadd.xlane.f32.xlu0 %v346_v22  ;;  %v1369_v27 = vmul.f32 %v1367_v23, %v52_v51  ;;  %v1366_v28 = vadd.f32 %v1364_v21, %v2094_v39  ;;  %v1402_v39 = vsel %vm286_vm3, %v1400_v37, 0.0 }
 0x8c9   :  { %v1401_v35 = vmul.f32 %v1399_v26, %v314_v60  ;;  %v335_v36 = vrot.slane %v334_v31, 1 }
 0x8ca   :  { %v1371_v32 = vsel %vm286_vm3, %v1369_v27, 0.0  ;;  %v1368_v33 = vsub.f32 %v2082_v30, %v1366_v28 }
 0x8cb   :  { %1372 = vadd.xlane.f32.xlu1 %v1371_v32  ;;  %v336_v38 = vadd.f32 %v335_v36, %v334_v31  ;;  %v1403_v40 = vsel %vm286_vm3, %v1401_v35, 0.0 }
 0x8cc   :  { %v1370_v1 = vmul.f32 %v1368_v33, %v53_v58  ;;  %v1404_v41 = vadd.f32 %v1403_v40, %v1402_v39 }
 0x8cd   :  { %1606 = vpush %v336_v38 }
 0x8ce   :  { %v1374_v25 = vsel %vm286_vm3, %v1370_v1, 0.0  ;;  %vm358_vm3 = vcmask 0  }
 0x8cf   :  { %1375 = vadd.xlane.f32.xlu0 %v1374_v25 }
 0x8d3   :  { %1405 = vadd.xlane.f32.xlu0 %v1404_v41 }
 0x8fe   :  { %s1607_s9 = spop %1606 }
 0x8ff   :  { %v338_v59 = vstv %s1607_s9 }
 0x900   :  { %v339_v60 = vmax.f32 %v338_v59, 1e-12 }
 0x902   :  { %1711 = vrcp.f32 %v339_v60 }
 0x90f   :  { %v1712_v61 = vpop.eup %1711 }
 0x951   :  { %v348_v43 = vpop.xlane.xlu0 %347 }
 0x952   :  { %v349_v44 = vrot.slane %v348_v43, 4 }
 0x954   :  { %v350_v45 = vadd.f32 %v349_v44, %v348_v43  ;;  %v1373_v30 = vpop.xlane.xlu1 %1372 }
 0x955   :  { %v1377_v6 = vsub.f32 0.0, %v1373_v30 }
 0x956   :  { %v351_v7 = vrot.slane %v350_v45, 2 }
 0x957   :  { %v1379_v49 = vmul.f32 %v1377_v6, %v2112_v62 }
 0x958   :  { %v1376_v46 = vpop.xlane.xlu0 %1375  ;;  %v352_v48 = vadd.f32 %v351_v7, %v350_v45 }
 0x959   :  { %v1378_v50 = vsub.f32 0.0, %v1376_v46  ;;  %v1381_v55 = vsel %vm325_vm5, %v1379_v49, 0.0 }
 0x95a   :  { %v353_v51 = vrot.slane %v352_v48, 1 }
 0x95b   :  { %v1380_v52 = vmul.f32 %v1378_v50, %v2117_v13 }
 0x95c   :  { %v354_v54 = vadd.f32 %v353_v51, %v352_v48 }
 0x95d   :  { %v1382_v57 = vsel %vm325_vm5, %v1380_v52, 0.0 }
 0x95e   :  { %1608 = vpush %v354_v54  ;;  %v1383_v58 = vadd.f32 %v1382_v57, %v1381_v55 }
 0x960   :  { %1384 = vadd.xlane.f32.xlu1 %v1383_v58 }
 0x98f   :  { %s1609_s10 = spop %1608 }
 0x990   :  { %v356_v34 = vstv %s1609_s10 }
 0x991   :  { %v357_v62 = vmul.f32 %v1712_v61, %v356_v34 }
 0x993   :  { %359 = vst.msk [vmem:[#allocation2] sm:$0x1] %vm358_vm3, %v357_v62 }
 0x994   :  { %1724 = shalt.err (!%p1721_p4)
}
 0x995   :  { %1431 = dma.vmem_to_hbm [thread:$0]  %s1429_s2, 16, %s2164_s13, [#allocation3]   ;;  %v1406_v13 = vpop.xlane.xlu0 %1405 }
 0x996   :  { %v1407_v63 = vrot.slane %v1406_v13, 4  ;;  %s1787_s26 = smov [#allocation4]   ;;  %s1788_s11 = smov [#allocation6]  }
 0x997   :  { %s1438_s27 = sshll.u32 %s1787_s26, 4  ;;  %s1448_s1 = sshll.u32 %s1788_s11, 4  ;;  %s1439_s27 = int_to_ptr.vmem [resolvable:$true] %s1438_s27  ;;  %s1449_s1 = int_to_ptr.vmem [resolvable:$true] %s1448_s1 }
 0x998   :  { %v1408_v16 = vadd.f32 %v1407_v63, %v1406_v13  ;;  %s1733_s28 = scalar_lea.vmem %s1439_s27, 16  ;;  %s1737_s29 = scalar_lea.vmem %s1439_s27, 32 }
 0x999   :  { %p1734_p5 = scmp.ne.s32.totalorder %s1439_s27, %s1733_s28  ;;  %p1738_p6 = scmp.lt.s32.totalorder %s1439_s27, %s1439_s27 }
 0x99a   :  { %v1409_v42 = vrot.slane %v1408_v16, 2  ;;  %p1739_p7 = scmp.lt.s32.totalorder %s1737_s29, %s1733_s28 }
 0x99c   :  { %v1410_v4 = vadd.f32 %v1409_v42, %v1408_v16  ;;  %p1740_p8 = por %p1739_p7, %p1738_p6 }
 0x99e   :  { %v1411_v10 = vrot.slane %v1410_v4, 1  ;;  %p1741_p9 = pnand %p1740_p8, %p1734_p5 }
 0x9a0   :  { %v1412_v11 = vadd.f32 %v1411_v10, %v1410_v4 }
 0x9e9   :  { %v1385_v47 = vpop.xlane.xlu1 %1384 }
 0x9ea   :  { %v1386_v0 = vrot.slane %v1385_v47, 4 }
 0x9ec   :  { %v1387_v3 = vadd.f32 %v1386_v0, %v1385_v47 }
 0x9ee   :  { %v1388_v5 = vrot.slane %v1387_v3, 2 }
 0x9f0   :  { %v1389_v9 = vadd.f32 %v1388_v5, %v1387_v3 }
 0x9f2   :  { %v1390_v53 = vrot.slane %v1389_v9, 1 }
 0x9f4   :  { %v1391_v56 = vadd.f32 %v1390_v53, %v1389_v9 }
 0x9f6   :  { %1610 = vpush %v1391_v56 }
 0x9f7   :  { %1612 = vpush %v1412_v11 }
 0xa27   :  { %s1611_s5 = spop %1610 }
 0xa28   :  { %v1393_v12 = vstv %s1611_s5  ;;  %s1613_s13 = spop %1612 }
 0xa29   :  { %v1394_v14 = vmul.f32 %v1712_v61, %v1393_v12  ;;  %v1414_v8 = vstv %s1613_s13 }
 0xa2a   :  { %v1415_v15 = vsub.f32 0.0, %v1414_v8 }
 0xa2b   :  { %1395 = vst.msk [vmem:[#allocation4] sm:$0x1] %vm358_vm3, %v1394_v14 }
 0xa2c   :  { %v1416_v2 = vmul.f32 0.0625, %v1415_v15 }
 0xa2d   :  { %1744 = shalt.err (!%p1741_p9)
}
 0xa2e   :  { %1441 = dma.vmem_to_hbm [thread:$0]  %s1439_s27, 16, %s2165_s14, [#allocation5]   ;;  %1417 = vst.msk [vmem:[#allocation6] sm:$0x1] %vm358_vm3, %v1416_v2 }
 0xa2f   :  { %s1753_s4 = scalar_lea.vmem %s1449_s1, 16  ;;  %s1757_s16 = scalar_lea.vmem %s1449_s1, 32 }
 0xa30   :  { %p1754_p10 = scmp.ne.s32.totalorder %s1449_s1, %s1753_s4  ;;  %p1758_p11 = scmp.lt.s32.totalorder %s1449_s1, %s1449_s1 }
 0xa31   :  { %p1759_p12 = scmp.lt.s32.totalorder %s1757_s16, %s1753_s4 }
 0xa33   :  { %p1760_p13 = por %p1759_p12, %p1758_p11 }
 0xa35   :  { %p1761_p0 = pnand %p1760_p13, %p1754_p10 }
 0xa37   :  { %1764 = shalt.err (!%p1761_p0)
}
 0xa38   :  { %1451 = dma.vmem_to_hbm [thread:$0]  %s1449_s1, 16, %s2166_s15, [#allocation5]  }
 0xa39   :  { %1773 = dma.done.wait [#allocation3], 16  }
 0xa3a   :  { %1774 = vsyncadd [#allocation3], 4294967280 }
 0xa3b   :  { %1775 = dma.done.wait [#allocation5], 32  }
 0xa3c   :  { %1776 = vsyncadd [#allocation5], 4294967264 }
 0xa3d   :  { %1465 = vsyncpa [#allocation3], 1 }
 0xa3e   :  { %1466 = vsyncpa [#allocation5], 1 }

</bundles_post_ra>
